<compile_context>
chip_gen: v6e
topology: v6e:2x2x1
jax: 0.10.0
libtpu: 0.0.40
codegen_flags: <defaults>
</compile_context>

<pallas_src>
import math
import functools

import jax
import jax.numpy as jnp
from jax.experimental import pallas as pl
from jax.experimental.pallas import tpu as pltpu


# ------------------------------- config (toy) -------------------------------
# Small synthetic config (stands in for Longformer's 768-hidden / 12-head config).
VOCAB = 50
MAX_POS = 64
HIDDEN = 32           # real Longformer: 768
HEADS = 2             # real: 12
HEAD_DIM = HIDDEN // HEADS
FFN = 64              # real: 3072
LAYERS = 2
WINDOW = 2            # one-sided sliding-attention window (real: 256)
NUM_LABELS = 3
ACT_DTYPE = jnp.bfloat16   # bf16 MXU inputs; accumulation & epilogues stay f32


def _round_up(x, m):
    return (x + m - 1) // m * m


def _pick_block_m(M, K, N, requested=None):
    """Rows per grid step for M-tiled kernels.

    Budget ~8 MiB for the widest f32 tile so a double-buffered pair stays well
    inside v7x's 64 MiB VMEM (and v5e's smaller scoped default); cap at 1024
    rows and keep it a divisor of M (multiple of 8).
    """
    if requested is not None:
        return requested
    row_bytes = 4 * max(K, N)
    cap = max(8, min(1024, (8 * 1024 * 1024) // row_bytes))
    if M <= cap:
        return M
    for c in (1024, 512, 256, 128, 64, 32, 16, 8):
        if c <= cap and M % c == 0:
            return c
    return M


# ----------------------------- Pallas kernels ------------------------------


def pallas_linear(x, w, b, *, act=None, out_dtype=None, block_m=None):
    """y = act(x @ w + b), tiled over rows.  x:[M,K] (bf16), w:[K,N] (bf16), b:[N] (f32)."""
    M, K = x.shape
    N = w.shape[1]
    out_dtype = out_dtype or x.dtype
    bm = _pick_block_m(M, K, N, block_m)

    def kernel(x_ref, w_ref, b_ref, o_ref):
        y = jnp.dot(x_ref[...], w_ref[...], preferred_element_type=jnp.float32)
        y = y + b_ref[...]
        if act is not None:
            y = act(y)
        o_ref[...] = y.astype(o_ref.dtype)

    return pl.pallas_call(
        kernel,
        out_shape=jax.ShapeDtypeStruct((M, N), out_dtype),
        grid=(M // bm,),
        in_specs=[pl.BlockSpec((bm, K), lambda i: (i, 0)),
                  pl.BlockSpec((K, N), lambda i: (0, 0)),
                  pl.BlockSpec((1, N), lambda i: (0, 0))],
        out_specs=pl.BlockSpec((bm, N), lambda i: (i, 0)),
        compiler_params=pltpu.CompilerParams(dimension_semantics=("parallel",)),
    )(x, w, b.reshape(1, N))


def pallas_layernorm(x, gamma, beta, *, eps=1e-5, out_dtype=None, block_m=None):
    """LayerNorm(x) * gamma + beta over the last dim, tiled over rows."""
    M, H = x.shape
    out_dtype = out_dtype or x.dtype
    bm = _pick_block_m(M, H, H, block_m)

    def kernel(x_ref, g_ref, b_ref, o_ref):
        h = x_ref[...].astype(jnp.float32)
        mu = jnp.mean(h, axis=-1, keepdims=True)
        var = jnp.mean(jnp.square(h - mu), axis=-1, keepdims=True)
        y = (h - mu) * jax.lax.rsqrt(var + eps)
        o_ref[...] = (y * g_ref[...] + b_ref[...]).astype(o_ref.dtype)

    return pl.pallas_call(
        kernel,
        out_shape=jax.ShapeDtypeStruct((M, H), out_dtype),
        grid=(M // bm,),
        in_specs=[pl.BlockSpec((bm, H), lambda i: (i, 0)),
                  pl.BlockSpec((1, H), lambda i: (0, 0)),
                  pl.BlockSpec((1, H), lambda i: (0, 0))],
        out_specs=pl.BlockSpec((bm, H), lambda i: (i, 0)),
        compiler_params=pltpu.CompilerParams(dimension_semantics=("parallel",)),
    )(x, gamma.reshape(1, H), beta.reshape(1, H))


def pallas_ffn_add_ln(x, w1, b1, w2, b2, gamma, beta, *, eps=1e-5,
                      out_dtype=None, block_m=None):
    """LayerNorm( gelu(x @ w1 + b1) @ w2 + b2 + x ) — whole FFN block in one kernel.

    The [bm, FFN] intermediate activation stays entirely in VMEM (never hits HBM).
    """
    M, H = x.shape
    F = w1.shape[1]
    out_dtype = out_dtype or x.dtype
    bm = _pick_block_m(M, H, F, block_m)
    gelu = functools.partial(jax.nn.gelu, approximate=True)  # HF uses exact erf GELU
    # TODO(synk): exact erf GELU (HF default) not used; tanh approximation instead.

    def kernel(x_ref, w1_ref, b1_ref, w2_ref, b2_ref, g_ref, bt_ref, o_ref):
        h = jnp.dot(x_ref[...], w1_ref[...], preferred_element_type=jnp.float32)
        h = gelu(h + b1_ref[...])
        y = jnp.dot(h.astype(w2_ref.dtype), w2_ref[...],
                    preferred_element_type=jnp.float32)
        y = y + b2_ref[...] + x_ref[...].astype(jnp.float32)       # residual add
        mu = jnp.mean(y, axis=-1, keepdims=True)
        var = jnp.mean(jnp.square(y - mu), axis=-1, keepdims=True)
        yn = (y - mu) * jax.lax.rsqrt(var + eps)
        o_ref[...] = (yn * g_ref[...] + bt_ref[...]).astype(o_ref.dtype)

    return pl.pallas_call(
        kernel,
        out_shape=jax.ShapeDtypeStruct((M, H), out_dtype),
        grid=(M // bm,),
        in_specs=[pl.BlockSpec((bm, H), lambda i: (i, 0)),
                  pl.BlockSpec((H, F), lambda i: (0, 0)),
                  pl.BlockSpec((1, F), lambda i: (0, 0)),
                  pl.BlockSpec((F, H), lambda i: (0, 0)),
                  pl.BlockSpec((1, H), lambda i: (0, 0)),
                  pl.BlockSpec((1, H), lambda i: (0, 0)),
                  pl.BlockSpec((1, H), lambda i: (0, 0))],
        out_specs=pl.BlockSpec((bm, H), lambda i: (i, 0)),
        compiler_params=pltpu.CompilerParams(dimension_semantics=("parallel",)),
    )(x, w1, b1.reshape(1, F), w2, b2.reshape(1, H),
      gamma.reshape(1, H), beta.reshape(1, H))


def _pick_attn_block(S, window):
    """Smallest block that covers the one-sided window, divides S, is >=8 rows
    (128-ish when the sequence allows) and still leaves >= 2 key blocks."""
    lo = max(8, window)
    target = max(lo, min(128, S // 2 if S >= 16 else S))
    for c in (8, 16, 32, 64, 128, 256, 512, 1024):
        if c >= target and c < S and S % c == 0:
            return c
    return S


def pallas_local_attention_proj_ln(q, k, v, mask, res, wo, bo, gamma, beta, *,
                                   window, eps=1e-5, block_q=None):
    """Banded sliding-window (Longformer local) attention fused with the output
    projection, residual add and LayerNorm.

    q,k,v : [B, heads, S, Dh]     mask : [B, S]  (1.0 = real token, 0.0 = padding)
    res   : [B, S, H]  layer input (residual)    wo : [H, H]   bo/gamma/beta : [H]
    Attention restricted to |i - j| <= window and non-padded keys.
    Returns LayerNorm(attn @ wo + bo + res) : [B, S, H].
    """
    B, Hn, S, Dh = q.shape
    H = Hn * Dh
    T = block_q or _pick_attn_block(S, window)
    assert S % T == 0 and T >= window, "attention block must divide S and cover the window"
    nQ = S // T
    nK = nQ
    scale = 1.0 / math.sqrt(Dh)
    neg = -1e30

    def kernel(q_ref, k_ref, v_ref, m_ref, r_ref, wo_ref, bo_ref, g_ref, bt_ref,
               o_ref, acc_ref, m_scr, l_scr, mrg_scr):
        qi = pl.program_id(1)
        j = pl.program_id(2)

        @pl.when(j == 0)
        def _():
            m_scr[...] = jnp.full_like(m_scr, neg)
            l_scr[...] = jnp.zeros_like(l_scr)
            acc_ref[...] = jnp.zeros_like(acc_ref)

        qh = q_ref[0]          # (Hn, T, Dh)  -- all heads of this query block
        kh = k_ref[0]          # (Hn, T, Dh)  -- neighbor key block
        vh = v_ref[0]

        s = jnp.einsum("hqd,hkd->hqk", qh, kh,
                       preferred_element_type=jnp.float32) * scale   # (Hn, T, T)

        # Small per-block band mask (T x T) — never an S x S mask.
        blk = qi + j - 1
        blk_c = jnp.clip(blk, 0, nK - 1)
        row = qi * T + jax.lax.broadcasted_iota(jnp.int32, (T, T), 0)
        col = blk_c * T + jax.lax.broadcasted_iota(jnp.int32, (T, T), 1)
        band = jnp.abs(row - col) <= window
        in_range = jnp.logical_and(blk >= 0, blk <= nK - 1)   # clamped blocks are duplicates
        keym = m_ref[0, 0] > 0.5                               # (1, T) padding mask for keys
        valid = jnp.logical_and(jnp.logical_and(band, keym), in_range)
        s = jnp.where(valid[None, :, :], s, neg)

        # Online softmax across the (up to) 3 in-band key blocks.
        m_prev = m_scr[...]
        m_new = jnp.maximum(m_prev, jnp.max(s, axis=-1, keepdims=True))
        alpha = jnp.exp(m_prev - m_new)
        p = jnp.exp(s - m_new)
        l_scr[...] = alpha * l_scr[...] + jnp.sum(p, axis=-1, keepdims=True)
        acc_ref[...] = alpha * acc_ref[...] + jnp.einsum(
            "hqk,hkd->hqd", p.astype(vh.dtype), vh,
            preferred_element_type=jnp.float32)
        m_scr[...] = m_new

        @pl.when(j == pl.num_programs(2) - 1)
        def _():
            inv = pl.reciprocal(l_scr[...], approx=True)        # EUP slot, ~free
            out = acc_ref[...] * inv                            # (Hn, T, Dh) f32
            for h in range(Hn):                                 # merge heads -> (T, H) in VMEM
                mrg_scr[:, pl.ds(h * Dh, Dh)] = out[h]
            attn_th = mrg_scr[...].astype(wo_ref.dtype)         # (T, H) bf16
            # fused output projection + residual add + LayerNorm epilogue
            proj = jnp.dot(attn_th, wo_ref[...],
                           preferred_element_type=jnp.float32)
            y = proj + bo_ref[...] + r_ref[0].astype(jnp.float32)
            mu = jnp.mean(y, axis=-1, keepdims=True)
            var = jnp.mean(jnp.square(y - mu), axis=-1, keepdims=True)
            yn = (y - mu) * jax.lax.rsqrt(var + eps)
            o_ref[0] = (yn * g_ref[...] + bt_ref[...]).astype(o_ref.dtype)

    qspec = pl.BlockSpec((1, Hn, T, Dh), lambda b, qi, j: (b, 0, qi, 0))
    kvspec = pl.BlockSpec((1, Hn, T, Dh),
                          lambda b, qi, j: (b, 0, jnp.clip(qi + j - 1, 0, nK - 1), 0))
    mspec = pl.BlockSpec((1, 1, 1, T),
                         lambda b, qi, j: (b, jnp.clip(qi + j - 1, 0, nK - 1), 0, 0))
    rspec = pl.BlockSpec((1, T, H), lambda b, qi, j: (b, qi, 0))
    wspec = pl.BlockSpec((H, H), lambda b, qi, j: (0, 0))
    vecspec = pl.BlockSpec((1, H), lambda b, qi, j: (0, 0))

    mask4 = mask.astype(jnp.float32).reshape(B, nK, 1, T)

    return pl.pallas_call(
        kernel,
        out_shape=jax.ShapeDtypeStruct((B, S, H), q.dtype),
        grid=(B, nQ, 3),
        in_specs=[qspec, kvspec, kvspec, mspec, rspec, wspec, vecspec, vecspec, vecspec],
        out_specs=pl.BlockSpec((1, T, H), lambda b, qi, j: (b, qi, 0)),
        scratch_shapes=[pltpu.VMEM((Hn, T, Dh), jnp.float32),
                        pltpu.VMEM((Hn, T, 1), jnp.float32),
                        pltpu.VMEM((Hn, T, 1), jnp.float32),
                        pltpu.VMEM((T, H), jnp.float32)],
        compiler_params=pltpu.CompilerParams(
            dimension_semantics=("parallel", "parallel", "arbitrary")),
    )(q, k, v, mask4, res, wo,
      bo.reshape(1, H), gamma.reshape(1, H), beta.reshape(1, H))


# ----------------------------- model wrapper -------------------------------


def init_params(key):
    cnt = [0]

    def nrm(shape, scale=0.02):
        cnt[0] += 1
        return scale * jax.random.normal(jax.random.fold_in(key, cnt[0]),
                                         shape, dtype=jnp.float32)

    n_pad = _round_up(NUM_LABELS, 128)   # lane-dense classifier output slab
    cls_w = jnp.zeros((HIDDEN, n_pad), jnp.float32).at[:, :NUM_LABELS].set(
        nrm((HIDDEN, NUM_LABELS)))

    p = {
        "word_emb": nrm((VOCAB, HIDDEN)),
        "pos_emb": nrm((MAX_POS, HIDDEN)),
        "tt_emb": nrm((1, HIDDEN)),
        "emb_ln_g": jnp.ones((HIDDEN,), jnp.float32),
        "emb_ln_b": jnp.zeros((HIDDEN,), jnp.float32),
        "cls_w": cls_w.astype(ACT_DTYPE),
        "cls_b": jnp.zeros((n_pad,), jnp.float32),
        "layers": [],
    }
    for _ in range(LAYERS):
        wq, wk, wv = (nrm((HIDDEN, HIDDEN)) for _ in range(3))
        p["layers"].append({
            # fused QKV projection: one [H, 3H] matmul instead of three [H, H] ones
            "w_qkv": jnp.concatenate([wq, wk, wv], axis=1).astype(ACT_DTYPE),
            "b_qkv": jnp.zeros((3 * HIDDEN,), jnp.float32),
            "wo": nrm((HIDDEN, HIDDEN)).astype(ACT_DTYPE),
            "bo": jnp.zeros((HIDDEN,), jnp.float32),
            "ln1_g": jnp.ones((HIDDEN,), jnp.float32),
            "ln1_b": jnp.zeros((HIDDEN,), jnp.float32),
            "w1": nrm((HIDDEN, FFN)).astype(ACT_DTYPE),
            "b1": jnp.zeros((FFN,), jnp.float32),
            "w2": nrm((FFN, HIDDEN)).astype(ACT_DTYPE),
            "b2": jnp.zeros((HIDDEN,), jnp.float32),
            "ln2_g": jnp.ones((HIDDEN,), jnp.float32),
            "ln2_b": jnp.zeros((HIDDEN,), jnp.float32),
        })
    return p


def forward(params, input_ids, attention_mask):
    """input_ids:[B,S] int32, attention_mask:[B,S] float -> logits [B,S,num_labels]."""
    B, S = input_ids.shape
    M = B * S

    # --- embeddings (gather / adds are XLA glue; LayerNorm is a Pallas kernel) ---
    # TODO(synk): Longformer's position-id offset (padding_idx + 1) is not applied.
    x = (jnp.take(params["word_emb"], input_ids, axis=0)
         + params["pos_emb"][:S][None, :, :]
         + params["tt_emb"][0][None, None, :])                       # [B,S,H] f32
    x = pallas_layernorm(x.reshape(M, HIDDEN),
                         params["emb_ln_g"], params["emb_ln_b"],
                         out_dtype=ACT_DTYPE)                        # [M,H] bf16

    def to_heads(t):   # [M,H] -> [B,heads,S,Dh]   (glue transpose)
        return t.reshape(B, S, HEADS, HEAD_DIM).transpose(0, 2, 1, 3)

    for lp in params["layers"]:
        # --- sliding-window self-attention block ---
        qkv = pallas_linear(x, lp["w_qkv"], lp["b_qkv"])             # fused QKV [M,3H]
        q, k, v = jnp.split(qkv, 3, axis=-1)
        # TODO(synk): Longformer global attention (mask==2) and dilation are not
        # implemented; only the sliding-window local path + padding mask.
        x = pallas_local_attention_proj_ln(
            to_heads(q), to_heads(k), to_heads(v), attention_mask,
            x.reshape(B, S, HIDDEN), lp["wo"], lp["bo"],
            lp["ln1_g"], lp["ln1_b"], window=WINDOW)                 # [B,S,H] (attn+proj+add+LN)
        x = x.reshape(M, HIDDEN)

        # --- feed-forward block: matmul1 + GELU + matmul2 + residual + LN, one kernel ---
        x = pallas_ffn_add_ln(x, lp["w1"], lp["b1"], lp["w2"], lp["b2"],
                              lp["ln2_g"], lp["ln2_b"])

    # --- classifier head on last_hidden_state (128-padded, lane-dense output) ---
    logits = pallas_linear(x, params["cls_w"], params["cls_b"],
                           out_dtype=jnp.float32)                    # [M, 128]
    return logits[:, :NUM_LABELS].reshape(B, S, NUM_LABELS)


# --------------------------------- main -------------------------------------

if __name__ == "__main__":
    B, S = 2, 16
    key = jax.random.PRNGKey(0)
    params = init_params(key)

    input_ids = jax.random.randint(jax.random.fold_in(key, 1000),
                                   (B, S), 0, VOCAB, dtype=jnp.int32)
    # second sequence has 5 padding tokens at the end
    attention_mask = jnp.stack([
        jnp.ones((S,), jnp.float32),
        jnp.concatenate([jnp.ones((S - 5,), jnp.float32),
                         jnp.zeros((5,), jnp.float32)]),
    ], axis=0)

    batch = {"input_ids": input_ids, "attention_masks": attention_mask}

    fwd = jax.jit(forward)
    logits = fwd(params, batch["input_ids"], batch["attention_masks"])
    logits = jax.block_until_ready(logits)

    assert logits.shape == (B, S, NUM_LABELS)
    assert bool(jnp.all(jnp.isfinite(logits)))
    print("KERNEL_OK")
</pallas_src>

<mosaic_0001>
module attributes {stable_mosaic.version = 11 : i64} {
  func.func @kernel(%arg0: i32, %arg1: memref<32x32xbf16, #tpu.memory_space<vmem>>, %arg2: memref<32x96xbf16, #tpu.memory_space<vmem>>, %arg3: memref<1x96xf32, #tpu.memory_space<vmem>>, %arg4: memref<32x96xbf16, #tpu.memory_space<vmem>>) attributes {dimension_semantics = [#tpu.dimension_semantics<parallel>], iteration_bounds = array<i64: 1>, scalar_prefetch = 0 : i64, scratch_operands = 0 : i64, tpu.core_type = #tpu.core_type<tc>, window_params = [{transform_indices = @transform_0, window_bounds = array<i64: 32, 32>}, {pipeline_mode = #tpu.pipeline_mode<synchronous>, transform_indices = @transform_1, window_bounds = array<i64: 32, 96>}, {pipeline_mode = #tpu.pipeline_mode<synchronous>, transform_indices = @transform_2, window_bounds = array<i64: 1, 96>}, {transform_indices = @transform_3, window_bounds = array<i64: 32, 96>}]} {
    %c0 = arith.constant 0 : index
    %c0_0 = arith.constant 0 : index
    %0 = vector.load %arg1[%c0, %c0_0] : memref<32x32xbf16, #tpu.memory_space<vmem>>, vector<32x32xbf16>
    %c0_1 = arith.constant 0 : index
    %c0_2 = arith.constant 0 : index
    %1 = vector.load %arg2[%c0_1, %c0_2] : memref<32x96xbf16, #tpu.memory_space<vmem>>, vector<32x96xbf16>
    %cst = arith.constant dense<0.000000e+00> : vector<32x96xf32>
    %2 = tpu.matmul %0, %1, %cst {dimension_numbers = #tpu.dot_dimension_numbers<[1], [0], [0], [1], [0, 0, 1, 1], [], []>} : vector<32x32xbf16>, vector<32x96xbf16>, vector<32x96xf32> -> vector<32x96xf32>
    %c0_3 = arith.constant 0 : index
    %c0_4 = arith.constant 0 : index
    %3 = vector.load %arg3[%c0_3, %c0_4] : memref<1x96xf32, #tpu.memory_space<vmem>>, vector<1x96xf32>
    %4 = vector.broadcast %3 : vector<1x96xf32> to vector<32x96xf32>
    %5 = arith.addf %2, %4 : vector<32x96xf32>
    %6 = arith.truncf %5 : vector<32x96xf32> to vector<32x96xbf16>
    %c0_5 = arith.constant 0 : index
    %c0_6 = arith.constant 0 : index
    %7 = vector.load %arg4[%c0_5, %c0_6] : memref<32x96xbf16, #tpu.memory_space<vmem>>, vector<32x96xbf16>
    tpu.vector_store %arg4[%c0_5, %c0_6], %6 {strides = array<i32>} : memref<32x96xbf16, #tpu.memory_space<vmem>>, vector<32x96xbf16>,
    return
  }
  func.func @transform_0(%arg0: i32) -> (i32, i32) {
    %c0_i32 = arith.constant 0 : i32
    %c0_i32_0 = arith.constant 0 : i32
    return %arg0, %c0_i32 : i32, i32
  }
  func.func @transform_1(%arg0: i32) -> (i32, i32) {
    %c0_i32 = arith.constant 0 : i32
    %c0_i32_0 = arith.constant 0 : i32
    %c0_i32_1 = arith.constant 0 : i32
    return %c0_i32, %c0_i32_0 : i32, i32
  }
  func.func @transform_2(%arg0: i32) -> (i32, i32) {
    %c0_i32 = arith.constant 0 : i32
    %c0_i32_0 = arith.constant 0 : i32
    %c0_i32_1 = arith.constant 0 : i32
    return %c0_i32, %c0_i32_0 : i32, i32
  }
  func.func @transform_3(%arg0: i32) -> (i32, i32) {
    %c0_i32 = arith.constant 0 : i32
    %c0_i32_0 = arith.constant 0 : i32
    return %arg0, %c0_i32 : i32, i32
  }
}

module attributes {stable_mosaic.version = 11 : i64} {
  func.func @kernel(%arg0: i32, %arg1: memref<32x32xf32, #tpu.memory_space<vmem>>, %arg2: memref<1x32xf32, #tpu.memory_space<vmem>>, %arg3: memref<1x32xf32, #tpu.memory_space<vmem>>, %arg4: memref<32x32xbf16, #tpu.memory_space<vmem>>) attributes {dimension_semantics = [#tpu.dimension_semantics<parallel>], iteration_bounds = array<i64: 1>, scalar_prefetch = 0 : i64, scratch_operands = 0 : i64, tpu.core_type = #tpu.core_type<tc>, window_params = [{transform_indices = @transform_0, window_bounds = array<i64: 32, 32>}, {pipeline_mode = #tpu.pipeline_mode<synchronous>, transform_indices = @transform_1, window_bounds = array<i64: 1, 32>}, {pipeline_mode = #tpu.pipeline_mode<synchronous>, transform_indices = @transform_2, window_bounds = array<i64: 1, 32>}, {transform_indices = @transform_3, window_bounds = array<i64: 32, 32>}]} {
    %c0 = arith.constant 0 : index
    %c0_0 = arith.constant 0 : index
    %0 = vector.load %arg1[%c0, %c0_0] : memref<32x32xf32, #tpu.memory_space<vmem>>, vector<32x32xf32>
    %cst = arith.constant dense<0.000000e+00> : vector<32xf32>
    %1 = vector.multi_reduction <add>, %0, %cst [1] : vector<32x32xf32> to vector<32xf32>
    %2 = vector.shape_cast %1 : vector<32xf32> to vector<32x1xf32>
    %cst_1 = arith.constant 3.200000e+01 : f32
    %3 = vector.broadcast %cst_1 : f32 to vector<32x1xf32>
    %4 = arith.divf %2, %3 : vector<32x1xf32>
    %5 = vector.broadcast %4 : vector<32x1xf32> to vector<32x32xf32>
    %6 = arith.subf %0, %5 : vector<32x32xf32>
    %7 = arith.mulf %6, %6 : vector<32x32xf32>
    %cst_2 = arith.constant dense<0.000000e+00> : vector<32xf32>
    %8 = vector.multi_reduction <add>, %7, %cst_2 [1] : vector<32x32xf32> to vector<32xf32>
    %9 = vector.shape_cast %8 : vector<32xf32> to vector<32x1xf32>
    %cst_3 = arith.constant 3.200000e+01 : f32
    %10 = vector.broadcast %cst_3 : f32 to vector<32x1xf32>
    %11 = arith.divf %9, %10 : vector<32x1xf32>
    %12 = vector.broadcast %4 : vector<32x1xf32> to vector<32x32xf32>
    %13 = arith.subf %0, %12 : vector<32x32xf32>
    %cst_4 = arith.constant 9.99999974E-6 : f32
    %14 = vector.broadcast %cst_4 : f32 to vector<32x1xf32>
    %15 = arith.addf %11, %14 : vector<32x1xf32>
    %16 = math.rsqrt %15 : vector<32x1xf32>
    %17 = vector.broadcast %16 : vector<32x1xf32> to vector<32x32xf32>
    %18 = arith.mulf %13, %17 : vector<32x32xf32>
    %c0_5 = arith.constant 0 : index
    %c0_6 = arith.constant 0 : index
    %19 = vector.load %arg2[%c0_5, %c0_6] : memref<1x32xf32, #tpu.memory_space<vmem>>, vector<1x32xf32>
    %20 = vector.broadcast %19 : vector<1x32xf32> to vector<32x32xf32>
    %21 = arith.mulf %18, %20 : vector<32x32xf32>
    %c0_7 = arith.constant 0 : index
    %c0_8 = arith.constant 0 : index
    %22 = vector.load %arg3[%c0_7, %c0_8] : memref<1x32xf32, #tpu.memory_space<vmem>>, vector<1x32xf32>
    %23 = vector.broadcast %22 : vector<1x32xf32> to vector<32x32xf32>
    %24 = arith.addf %21, %23 : vector<32x32xf32>
    %25 = arith.truncf %24 : vector<32x32xf32> to vector<32x32xbf16>
    %c0_9 = arith.constant 0 : index
    %c0_10 = arith.constant 0 : index
    %26 = vector.load %arg4[%c0_9, %c0_10] : memref<32x32xbf16, #tpu.memory_space<vmem>>, vector<32x32xbf16>
    tpu.vector_store %arg4[%c0_9, %c0_10], %25 {strides = array<i32>} : memref<32x32xbf16, #tpu.memory_space<vmem>>, vector<32x32xbf16>,
    return
  }
  func.func @transform_0(%arg0: i32) -> (i32, i32) {
    %c0_i32 = arith.constant 0 : i32
    %c0_i32_0 = arith.constant 0 : i32
    return %arg0, %c0_i32 : i32, i32
  }
  func.func @transform_1(%arg0: i32) -> (i32, i32) {
    %c0_i32 = arith.constant 0 : i32
    %c0_i32_0 = arith.constant 0 : i32
    %c0_i32_1 = arith.constant 0 : i32
    return %c0_i32, %c0_i32_0 : i32, i32
  }
  func.func @transform_2(%arg0: i32) -> (i32, i32) {
    %c0_i32 = arith.constant 0 : i32
    %c0_i32_0 = arith.constant 0 : i32
    %c0_i32_1 = arith.constant 0 : i32
    return %c0_i32, %c0_i32_0 : i32, i32
  }
  func.func @transform_3(%arg0: i32) -> (i32, i32) {
    %c0_i32 = arith.constant 0 : i32
    %c0_i32_0 = arith.constant 0 : i32
    return %arg0, %c0_i32 : i32, i32
  }
}

module attributes {stable_mosaic.version = 11 : i64} {
  func.func @kernel(%arg0: i32, %arg1: i32, %arg2: i32, %arg3: memref<1x2x8x16xbf16, #tpu.memory_space<vmem>>, %arg4: memref<1x2x8x16xbf16, #tpu.memory_space<vmem>>, %arg5: memref<1x2x8x16xbf16, #tpu.memory_space<vmem>>, %arg6: memref<1x1x1x8xf32, #tpu.memory_space<vmem>>, %arg7: memref<1x8x32xbf16, #tpu.memory_space<vmem>>, %arg8: memref<32x32xbf16, #tpu.memory_space<vmem>>, %arg9: memref<1x32xf32, #tpu.memory_space<vmem>>, %arg10: memref<1x32xf32, #tpu.memory_space<vmem>>, %arg11: memref<1x32xf32, #tpu.memory_space<vmem>>, %arg12: memref<1x8x32xbf16, #tpu.memory_space<vmem>>, %arg13: memref<2x8x16xf32, #tpu.memory_space<vmem>>, %arg14: memref<2x8x1xf32, #tpu.memory_space<vmem>>, %arg15: memref<2x8x1xf32, #tpu.memory_space<vmem>>, %arg16: memref<8x32xf32, #tpu.memory_space<vmem>>) attributes {dimension_semantics = [#tpu.dimension_semantics<parallel>, #tpu.dimension_semantics<parallel>, #tpu.dimension_semantics<arbitrary>], iteration_bounds = array<i64: 2, 2, 3>, scalar_prefetch = 0 : i64, scratch_operands = 4 : i64, tpu.core_type = #tpu.core_type<tc>, window_params = [{transform_indices = @transform_0, window_bounds = array<i64: 1, 2, 8, 16>}, {transform_indices = @transform_1, window_bounds = array<i64: 1, 2, 8, 16>}, {transform_indices = @transform_2, window_bounds = array<i64: 1, 2, 8, 16>}, {transform_indices = @transform_3, window_bounds = array<i64: 1, 1, 1, 8>}, {transform_indices = @transform_4, window_bounds = array<i64: 1, 8, 32>}, {pipeline_mode = #tpu.pipeline_mode<synchronous>, transform_indices = @transform_5, window_bounds = array<i64: 32, 32>}, {pipeline_mode = #tpu.pipeline_mode<synchronous>, transform_indices = @transform_6, window_bounds = array<i64: 1, 32>}, {pipeline_mode = #tpu.pipeline_mode<synchronous>, transform_indices = @transform_7, window_bounds = array<i64: 1, 32>}, {pipeline_mode = #tpu.pipeline_mode<synchronous>, transform_indices = @transform_8, window_bounds = array<i64: 1, 32>}, {transform_indices = @transform_9, window_bounds = array<i64: 1, 8, 32>}]} {
    %c0_i32 = arith.constant 0 : i32
    %0 = arith.cmpi eq, %arg2, %c0_i32 : i32
    %1 = arith.extui %0 : i1 to i32
    %c0_i32_0 = arith.constant 0 : i32
    %2 = arith.cmpi ne, %1, %c0_i32_0 : i32
    scf.if %2 {
      %cst_47 = arith.constant -1.000000e+30 : f32
      %70 = vector.broadcast %cst_47 : f32 to vector<2x8x1xf32>
      %c0_48 = arith.constant 0 : index
      %c0_49 = arith.constant 0 : index
      %c0_50 = arith.constant 0 : index
      %71 = vector.load %arg14[%c0_48, %c0_49, %c0_50] : memref<2x8x1xf32, #tpu.memory_space<vmem>>, vector<2x8x1xf32>
      tpu.vector_store %arg14[%c0_48, %c0_49, %c0_50], %70 {strides = array<i32>} : memref<2x8x1xf32, #tpu.memory_space<vmem>>, vector<2x8x1xf32>,
      %cst_51 = arith.constant 0.000000e+00 : f32
      %72 = vector.broadcast %cst_51 : f32 to vector<2x8x1xf32>
      %c0_52 = arith.constant 0 : index
      %c0_53 = arith.constant 0 : index
      %c0_54 = arith.constant 0 : index
      %73 = vector.load %arg15[%c0_52, %c0_53, %c0_54] : memref<2x8x1xf32, #tpu.memory_space<vmem>>, vector<2x8x1xf32>
      tpu.vector_store %arg15[%c0_52, %c0_53, %c0_54], %72 {strides = array<i32>} : memref<2x8x1xf32, #tpu.memory_space<vmem>>, vector<2x8x1xf32>,
      %cst_55 = arith.constant 0.000000e+00 : f32
      %74 = vector.broadcast %cst_55 : f32 to vector<2x8x16xf32>
      %c0_56 = arith.constant 0 : index
      %c0_57 = arith.constant 0 : index
      %c0_58 = arith.constant 0 : index
      %75 = vector.load %arg13[%c0_56, %c0_57, %c0_58] : memref<2x8x16xf32, #tpu.memory_space<vmem>>, vector<2x8x16xf32>
      tpu.vector_store %arg13[%c0_56, %c0_57, %c0_58], %74 {strides = array<i32>} : memref<2x8x16xf32, #tpu.memory_space<vmem>>, vector<2x8x16xf32>,
    } else {
    }
    %c0 = arith.constant 0 : index
    %c0_1 = arith.constant 0 : index
    %c0_2 = arith.constant 0 : index
    %c0_3 = arith.constant 0 : index
    %3 = vector.load %arg3[%c0, %c0_1, %c0_2, %c0_3] : memref<1x2x8x16xbf16, #tpu.memory_space<vmem>>, vector<1x2x8x16xbf16>
    %4 = vector.shape_cast %3 : vector<1x2x8x16xbf16> to vector<2x8x16xbf16>
    %c0_4 = arith.constant 0 : index
    %c0_5 = arith.constant 0 : index
    %c0_6 = arith.constant 0 : index
    %c0_7 = arith.constant 0 : index
    %5 = vector.load %arg4[%c0_4, %c0_5, %c0_6, %c0_7] : memref<1x2x8x16xbf16, #tpu.memory_space<vmem>>, vector<1x2x8x16xbf16>
    %6 = vector.shape_cast %5 : vector<1x2x8x16xbf16> to vector<2x8x16xbf16>
    %c0_8 = arith.constant 0 : index
    %c0_9 = arith.constant 0 : index
    %c0_10 = arith.constant 0 : index
    %c0_11 = arith.constant 0 : index
    %7 = vector.load %arg5[%c0_8, %c0_9, %c0_10, %c0_11] : memref<1x2x8x16xbf16, #tpu.memory_space<vmem>>, vector<1x2x8x16xbf16>
    %8 = vector.shape_cast %7 : vector<1x2x8x16xbf16> to vector<2x8x16xbf16>
    "tpu.trace_start"() <{level = 10 : i32, message = "hqd,hkd->hqk"}> : () -> ()
    %cst = arith.constant dense<0.000000e+00> : vector<2x8x8xf32>
    %9 = tpu.matmul %4, %6, %cst {dimension_numbers = #tpu.dot_dimension_numbers<[2], [2], [1], [1], [0, 0, 0, 1, 1, 1], [0], [0]>} : vector<2x8x16xbf16>, vector<2x8x16xbf16>, vector<2x8x8xf32> -> vector<2x8x8xf32>
    "tpu.trace_stop"() : () -> ()
    %cst_12 = arith.constant 2.500000e-01 : f32
    %10 = vector.broadcast %cst_12 : f32 to vector<2x8x8xf32>
    %11 = arith.mulf %9, %10 : vector<2x8x8xf32>
    %12 = arith.addi %arg1, %arg2 : i32
    %c1_i32 = arith.constant 1 : i32
    %13 = arith.subi %12, %c1_i32 : i32
    %c0_i32_13 = arith.constant 0 : i32
    %c1_i32_14 = arith.constant 1 : i32
    %14 = arith.maxsi %c0_i32_13, %13 : i32
    %15 = arith.minsi %c1_i32_14, %14 : i32
    %c8_i32 = arith.constant 8 : i32
    %16 = arith.muli %arg1, %c8_i32 : i32
    %17 = tpu.iota {dimensions = array<i32: 0>} : vector<8x8xi32>
    %18 = vector.broadcast %16 : i32 to vector<8x8xi32>
    %19 = arith.addi %18, %17 : vector<8x8xi32>
    %c8_i32_15 = arith.constant 8 : i32
    %20 = arith.muli %15, %c8_i32_15 : i32
    %21 = tpu.iota {dimensions = array<i32: 1>} : vector<8x8xi32>
    %22 = vector.broadcast %20 : i32 to vector<8x8xi32>
    %23 = arith.addi %22, %21 : vector<8x8xi32>
    %24 = arith.subi %19, %23 : vector<8x8xi32>
    %25 = math.absi %24 : vector<8x8xi32>
    %c2_i32 = arith.constant 2 : i32
    %26 = vector.broadcast %c2_i32 : i32 to vector<8x8xi32>
    %27 = arith.cmpi sle, %25, %26 : vector<8x8xi32>
    %c0_i32_16 = arith.constant 0 : i32
    %28 = arith.cmpi sge, %13, %c0_i32_16 : i32
    %c1_i32_17 = arith.constant 1 : i32
    %29 = arith.cmpi sle, %13, %c1_i32_17 : i32
    %30 = arith.andi %28, %29 : i1
    %c0_18 = arith.constant 0 : index
    %c0_19 = arith.constant 0 : index
    %c0_20 = arith.constant 0 : index
    %c0_21 = arith.constant 0 : index
    %31 = vector.load %arg6[%c0_18, %c0_19, %c0_20, %c0_21] : memref<1x1x1x8xf32, #tpu.memory_space<vmem>>, vector<1x1x1x8xf32>
    %32 = vector.shape_cast %31 : vector<1x1x1x8xf32> to vector<1x8xf32>
    %cst_22 = arith.constant 5.000000e-01 : f32
    %33 = vector.broadcast %cst_22 : f32 to vector<1x8xf32>
    %34 = arith.cmpf ogt, %32, %33 : vector<1x8xf32>
    %35 = vector.broadcast %34 : vector<1x8xi1> to vector<8x8xi1>
    %36 = arith.andi %27, %35 : vector<8x8xi1>
    %37 = vector.broadcast %30 : i1 to vector<8x8xi1>
    %38 = arith.andi %36, %37 : vector<8x8xi1>
    %39 = vector.shape_cast %38 : vector<8x8xi1> to vector<1x8x8xi1>
    %cst_23 = arith.constant -1.000000e+30 : f32
    %40 = vector.shape_cast %39 : vector<1x8x8xi1> to vector<1x8x8xi1>
    %41 = vector.broadcast %40 : vector<1x8x8xi1> to vector<2x8x8xi1>
    %42 = vector.broadcast %cst_23 : f32 to vector<2x8x8xf32>
    %43 = arith.select %41, %11, %42 : vector<2x8x8xi1>, vector<2x8x8xf32>
    %c0_24 = arith.constant 0 : index
    %c0_25 = arith.constant 0 : index
    %c0_26 = arith.constant 0 : index
    %44 = vector.load %arg14[%c0_24, %c0_25, %c0_26] : memref<2x8x1xf32, #tpu.memory_space<vmem>>, vector<2x8x1xf32>
    %cst_27 = arith.constant dense<0xFF800000> : vector<2x8xf32>
    %45 = vector.multi_reduction <maximumf>, %43, %cst_27 [2] : vector<2x8x8xf32> to vector<2x8xf32>
    %46 = vector.shape_cast %45 : vector<2x8xf32> to vector<2x8x1xf32>
    %47 = arith.maximumf %44, %46 : vector<2x8x1xf32>
    %48 = arith.subf %44, %47 : vector<2x8x1xf32>
    %49 = math.exp %48 : vector<2x8x1xf32>
    %50 = vector.broadcast %47 : vector<2x8x1xf32> to vector<2x8x8xf32>
    %51 = arith.subf %43, %50 : vector<2x8x8xf32>
    %52 = math.exp %51 : vector<2x8x8xf32>
    %c0_28 = arith.constant 0 : index
    %c0_29 = arith.constant 0 : index
    %c0_30 = arith.constant 0 : index
    %53 = vector.load %arg15[%c0_28, %c0_29, %c0_30] : memref<2x8x1xf32, #tpu.memory_space<vmem>>, vector<2x8x1xf32>
    %54 = arith.mulf %49, %53 : vector<2x8x1xf32>
    %cst_31 = arith.constant dense<0.000000e+00> : vector<2x8xf32>
    %55 = vector.multi_reduction <add>, %52, %cst_31 [2] : vector<2x8x8xf32> to vector<2x8xf32>
    %56 = vector.shape_cast %55 : vector<2x8xf32> to vector<2x8x1xf32>
    %57 = arith.addf %54, %56 : vector<2x8x1xf32>
    %c0_32 = arith.constant 0 : index
    %c0_33 = arith.constant 0 : index
    %c0_34 = arith.constant 0 : index
    %58 = vector.load %arg15[%c0_32, %c0_33, %c0_34] : memref<2x8x1xf32, #tpu.memory_space<vmem>>, vector<2x8x1xf32>
    tpu.vector_store %arg15[%c0_32, %c0_33, %c0_34], %57 {strides = array<i32>} : memref<2x8x1xf32, #tpu.memory_space<vmem>>, vector<2x8x1xf32>,
    %c0_35 = arith.constant 0 : index
    %c0_36 = arith.constant 0 : index
    %c0_37 = arith.constant 0 : index
    %59 = vector.load %arg13[%c0_35, %c0_36, %c0_37] : memref<2x8x16xf32, #tpu.memory_space<vmem>>, vector<2x8x16xf32>
    %60 = vector.broadcast %49 : vector<2x8x1xf32> to vector<2x8x16xf32>
    %61 = arith.mulf %60, %59 : vector<2x8x16xf32>
    %62 = arith.truncf %52 : vector<2x8x8xf32> to vector<2x8x8xbf16>
    "tpu.trace_start"() <{level = 10 : i32, message = "hqk,hkd->hqd"}> : () -> ()
    %cst_38 = arith.constant dense<0.000000e+00> : vector<2x8x16xf32>
    %63 = tpu.matmul %62, %8, %cst_38 {dimension_numbers = #tpu.dot_dimension_numbers<[2], [1], [1], [2], [0, 0, 0, 1, 1, 2], [0], [0]>} : vector<2x8x8xbf16>, vector<2x8x16xbf16>, vector<2x8x16xf32> -> vector<2x8x16xf32>
    "tpu.trace_stop"() : () -> ()
    %64 = arith.addf %61, %63 : vector<2x8x16xf32>
    %c0_39 = arith.constant 0 : index
    %c0_40 = arith.constant 0 : index
    %c0_41 = arith.constant 0 : index
    %65 = vector.load %arg13[%c0_39, %c0_40, %c0_41] : memref<2x8x16xf32, #tpu.memory_space<vmem>>, vector<2x8x16xf32>
    tpu.vector_store %arg13[%c0_39, %c0_40, %c0_41], %64 {strides = array<i32>} : memref<2x8x16xf32, #tpu.memory_space<vmem>>, vector<2x8x16xf32>,
    %c0_42 = arith.constant 0 : index
    %c0_43 = arith.constant 0 : index
    %c0_44 = arith.constant 0 : index
    %66 = vector.load %arg14[%c0_42, %c0_43, %c0_44] : memref<2x8x1xf32, #tpu.memory_space<vmem>>, vector<2x8x1xf32>
    tpu.vector_store %arg14[%c0_42, %c0_43, %c0_44], %47 {strides = array<i32>} : memref<2x8x1xf32, #tpu.memory_space<vmem>>, vector<2x8x1xf32>,
    %c2_i32_45 = arith.constant 2 : i32
    %67 = arith.cmpi eq, %arg2, %c2_i32_45 : i32
    %68 = arith.extui %67 : i1 to i32
    %c0_i32_46 = arith.constant 0 : i32
    %69 = arith.cmpi ne, %68, %c0_i32_46 : i32
    scf.if %69 {
      %c0_47 = arith.constant 0 : index
      %c0_48 = arith.constant 0 : index
      %c0_49 = arith.constant 0 : index
      %70 = vector.load %arg15[%c0_47, %c0_48, %c0_49] : memref<2x8x1xf32, #tpu.memory_space<vmem>>, vector<2x8x1xf32>
      %71 = tpu.reciprocal %70 {approx = true} : vector<2x8x1xf32> -> vector<2x8x1xf32>
      %c0_50 = arith.constant 0 : index
      %c0_51 = arith.constant 0 : index
      %c0_52 = arith.constant 0 : index
      %72 = vector.load %arg13[%c0_50, %c0_51, %c0_52] : memref<2x8x16xf32, #tpu.memory_space<vmem>>, vector<2x8x16xf32>
      %73 = vector.broadcast %71 : vector<2x8x1xf32> to vector<2x8x16xf32>
      %74 = arith.mulf %72, %73 : vector<2x8x16xf32>
      %75 = vector.extract_strided_slice %74 {offsets = [0, 0, 0], sizes = [1, 8, 16], strides = [1, 1, 1]} : vector<2x8x16xf32> to vector<1x8x16xf32>
      %76 = vector.shape_cast %75 : vector<1x8x16xf32> to vector<8x16xf32>
      %c0_53 = arith.constant 0 : index
      %c0_54 = arith.constant 0 : index
      %77 = vector.load %arg16[%c0_53, %c0_54] : memref<8x32xf32, #tpu.memory_space<vmem>>, vector<8x16xf32>
      tpu.vector_store %arg16[%c0_53, %c0_54], %76 {strides = array<i32>} : memref<8x32xf32, #tpu.memory_space<vmem>>, vector<8x16xf32>,
      %78 = vector.extract_strided_slice %74 {offsets = [1, 0, 0], sizes = [1, 8, 16], strides = [1, 1, 1]} : vector<2x8x16xf32> to vector<1x8x16xf32>
      %79 = vector.shape_cast %78 : vector<1x8x16xf32> to vector<8x16xf32>
      %c0_55 = arith.constant 0 : index
      %c16 = arith.constant 16 : index
      %80 = vector.load %arg16[%c0_55, %c16] : memref<8x32xf32, #tpu.memory_space<vmem>>, vector<8x16xf32>
      tpu.vector_store %arg16[%c0_55, %c16], %79 {strides = array<i32>} : memref<8x32xf32, #tpu.memory_space<vmem>>, vector<8x16xf32>,
      %c0_56 = arith.constant 0 : index
      %c0_57 = arith.constant 0 : index
      %81 = vector.load %arg16[%c0_56, %c0_57] : memref<8x32xf32, #tpu.memory_space<vmem>>, vector<8x32xf32>
      %82 = arith.truncf %81 : vector<8x32xf32> to vector<8x32xbf16>
      %c0_58 = arith.constant 0 : index
      %c0_59 = arith.constant 0 : index
      %83 = vector.load %arg8[%c0_58, %c0_59] : memref<32x32xbf16, #tpu.memory_space<vmem>>, vector<32x32xbf16>
      %cst_60 = arith.constant dense<0.000000e+00> : vector<8x32xf32>
      %84 = tpu.matmul %82, %83, %cst_60 {dimension_numbers = #tpu.dot_dimension_numbers<[1], [0], [0], [1], [0, 0, 1, 1], [], []>} : vector<8x32xbf16>, vector<32x32xbf16>, vector<8x32xf32> -> vector<8x32xf32>
      %c0_61 = arith.constant 0 : index
      %c0_62 = arith.constant 0 : index
      %85 = vector.load %arg9[%c0_61, %c0_62] : memref<1x32xf32, #tpu.memory_space<vmem>>, vector<1x32xf32>
      %86 = vector.broadcast %85 : vector<1x32xf32> to vector<8x32xf32>
      %87 = arith.addf %84, %86 : vector<8x32xf32>
      %c0_63 = arith.constant 0 : index
      %c0_64 = arith.constant 0 : index
      %c0_65 = arith.constant 0 : index
      %88 = vector.load %arg7[%c0_63, %c0_64, %c0_65] : memref<1x8x32xbf16, #tpu.memory_space<vmem>>, vector<1x8x32xbf16>
      %89 = vector.shape_cast %88 : vector<1x8x32xbf16> to vector<8x32xbf16>
      %90 = arith.extf %89 : vector<8x32xbf16> to vector<8x32xf32>
      %91 = arith.addf %87, %90 : vector<8x32xf32>
      %cst_66 = arith.constant dense<0.000000e+00> : vector<8xf32>
      %92 = vector.multi_reduction <add>, %91, %cst_66 [1] : vector<8x32xf32> to vector<8xf32>
      %93 = vector.shape_cast %92 : vector<8xf32> to vector<8x1xf32>
      %cst_67 = arith.constant 3.200000e+01 : f32
      %94 = vector.broadcast %cst_67 : f32 to vector<8x1xf32>
      %95 = arith.divf %93, %94 : vector<8x1xf32>
      %96 = vector.broadcast %95 : vector<8x1xf32> to vector<8x32xf32>
      %97 = arith.subf %91, %96 : vector<8x32xf32>
      %98 = arith.mulf %97, %97 : vector<8x32xf32>
      %cst_68 = arith.constant dense<0.000000e+00> : vector<8xf32>
      %99 = vector.multi_reduction <add>, %98, %cst_68 [1] : vector<8x32xf32> to vector<8xf32>
      %100 = vector.shape_cast %99 : vector<8xf32> to vector<8x1xf32>
      %cst_69 = arith.constant 3.200000e+01 : f32
      %101 = vector.broadcast %cst_69 : f32 to vector<8x1xf32>
      %102 = arith.divf %100, %101 : vector<8x1xf32>
      %103 = vector.broadcast %95 : vector<8x1xf32> to vector<8x32xf32>
      %104 = arith.subf %91, %103 : vector<8x32xf32>
      %cst_70 = arith.constant 9.99999974E-6 : f32
      %105 = vector.broadcast %cst_70 : f32 to vector<8x1xf32>
      %106 = arith.addf %102, %105 : vector<8x1xf32>
      %107 = math.rsqrt %106 : vector<8x1xf32>
      %108 = vector.broadcast %107 : vector<8x1xf32> to vector<8x32xf32>
      %109 = arith.mulf %104, %108 : vector<8x32xf32>
      %c0_71 = arith.constant 0 : index
      %c0_72 = arith.constant 0 : index
      %110 = vector.load %arg10[%c0_71, %c0_72] : memref<1x32xf32, #tpu.memory_space<vmem>>, vector<1x32xf32>
      %111 = vector.broadcast %110 : vector<1x32xf32> to vector<8x32xf32>
      %112 = arith.mulf %109, %111 : vector<8x32xf32>
      %c0_73 = arith.constant 0 : index
      %c0_74 = arith.constant 0 : index
      %113 = vector.load %arg11[%c0_73, %c0_74] : memref<1x32xf32, #tpu.memory_space<vmem>>, vector<1x32xf32>
      %114 = vector.broadcast %113 : vector<1x32xf32> to vector<8x32xf32>
      %115 = arith.addf %112, %114 : vector<8x32xf32>
      %116 = arith.truncf %115 : vector<8x32xf32> to vector<8x32xbf16>
      %c0_75 = arith.constant 0 : index
      %c0_76 = arith.constant 0 : index
      %c0_77 = arith.constant 0 : index
      %117 = vector.load %arg12[%c0_75, %c0_76, %c0_77] : memref<1x8x32xbf16, #tpu.memory_space<vmem>>, vector<1x8x32xbf16>
      %118 = vector.shape_cast %117 : vector<1x8x32xbf16> to vector<8x32xbf16>
      %119 = vector.shape_cast %116 : vector<8x32xbf16> to vector<1x8x32xbf16>
      tpu.vector_store %arg12[%c0_75, %c0_76, %c0_77], %119 {strides = array<i32>} : memref<1x8x32xbf16, #tpu.memory_space<vmem>>, vector<1x8x32xbf16>,
    } else {
    }
    return
  }
  func.func @transform_0(%arg0: i32, %arg1: i32, %arg2: i32) -> (i32, i32, i32, i32) {
    %c0_i32 = arith.constant 0 : i32
    %c0_i32_0 = arith.constant 0 : i32
    %c0_i32_1 = arith.constant 0 : i32
    return %arg0, %c0_i32, %arg1, %c0_i32_0 : i32, i32, i32, i32
  }
  func.func @transform_1(%arg0: i32, %arg1: i32, %arg2: i32) -> (i32, i32, i32, i32) {
    %0 = arith.addi %arg1, %arg2 : i32
    %c1_i32 = arith.constant 1 : i32
    %1 = arith.subi %0, %c1_i32 : i32
    %c0_i32 = arith.constant 0 : i32
    %c1_i32_0 = arith.constant 1 : i32
    %2 = arith.maxsi %c0_i32, %1 : i32
    %3 = arith.minsi %c1_i32_0, %2 : i32
    %c0_i32_1 = arith.constant 0 : i32
    %c0_i32_2 = arith.constant 0 : i32
    %c0_i32_3 = arith.constant 0 : i32
    return %arg0, %c0_i32_1, %3, %c0_i32_2 : i32, i32, i32, i32
  }
  func.func @transform_2(%arg0: i32, %arg1: i32, %arg2: i32) -> (i32, i32, i32, i32) {
    %0 = arith.addi %arg1, %arg2 : i32
    %c1_i32 = arith.constant 1 : i32
    %1 = arith.subi %0, %c1_i32 : i32
    %c0_i32 = arith.constant 0 : i32
    %c1_i32_0 = arith.constant 1 : i32
    %2 = arith.maxsi %c0_i32, %1 : i32
    %3 = arith.minsi %c1_i32_0, %2 : i32
    %c0_i32_1 = arith.constant 0 : i32
    %c0_i32_2 = arith.constant 0 : i32
    %c0_i32_3 = arith.constant 0 : i32
    return %arg0, %c0_i32_1, %3, %c0_i32_2 : i32, i32, i32, i32
  }
  func.func @transform_3(%arg0: i32, %arg1: i32, %arg2: i32) -> (i32, i32, i32, i32) {
    %0 = arith.addi %arg1, %arg2 : i32
    %c1_i32 = arith.constant 1 : i32
    %1 = arith.subi %0, %c1_i32 : i32
    %c0_i32 = arith.constant 0 : i32
    %c1_i32_0 = arith.constant 1 : i32
    %2 = arith.maxsi %c0_i32, %1 : i32
    %3 = arith.minsi %c1_i32_0, %2 : i32
    %c0_i32_1 = arith.constant 0 : i32
    %c0_i32_2 = arith.constant 0 : i32
    %c0_i32_3 = arith.constant 0 : i32
    return %arg0, %3, %c0_i32_1, %c0_i32_2 : i32, i32, i32, i32
  }
  func.func @transform_4(%arg0: i32, %arg1: i32, %arg2: i32) -> (i32, i32, i32) {
    %c0_i32 = arith.constant 0 : i32
    %c0_i32_0 = arith.constant 0 : i32
    return %arg0, %arg1, %c0_i32 : i32, i32, i32
  }
  func.func @transform_5(%arg0: i32, %arg1: i32, %arg2: i32) -> (i32, i32) {
    %c0_i32 = arith.constant 0 : i32
    %c0_i32_0 = arith.constant 0 : i32
    %c0_i32_1 = arith.constant 0 : i32
    return %c0_i32, %c0_i32_0 : i32, i32
  }
  func.func @transform_6(%arg0: i32, %arg1: i32, %arg2: i32) -> (i32, i32) {
    %c0_i32 = arith.constant 0 : i32
    %c0_i32_0 = arith.constant 0 : i32
    %c0_i32_1 = arith.constant 0 : i32
    return %c0_i32, %c0_i32_0 : i32, i32
  }
  func.func @transform_7(%arg0: i32, %arg1: i32, %arg2: i32) -> (i32, i32) {
    %c0_i32 = arith.constant 0 : i32
    %c0_i32_0 = arith.constant 0 : i32
    %c0_i32_1 = arith.constant 0 : i32
    return %c0_i32, %c0_i32_0 : i32, i32
  }
  func.func @transform_8(%arg0: i32, %arg1: i32, %arg2: i32) -> (i32, i32) {
    %c0_i32 = arith.constant 0 : i32
    %c0_i32_0 = arith.constant 0 : i32
    %c0_i32_1 = arith.constant 0 : i32
    return %c0_i32, %c0_i32_0 : i32, i32
  }
  func.func @transform_9(%arg0: i32, %arg1: i32, %arg2: i32) -> (i32, i32, i32) {
    %c0_i32 = arith.constant 0 : i32
    %c0_i32_0 = arith.constant 0 : i32
    return %arg0, %arg1, %c0_i32 : i32, i32, i32
  }
}

module attributes {stable_mosaic.version = 11 : i64} {
  func.func @kernel(%arg0: i32, %arg1: memref<32x32xbf16, #tpu.memory_space<vmem>>, %arg2: memref<32x64xbf16, #tpu.memory_space<vmem>>, %arg3: memref<1x64xf32, #tpu.memory_space<vmem>>, %arg4: memref<64x32xbf16, #tpu.memory_space<vmem>>, %arg5: memref<1x32xf32, #tpu.memory_space<vmem>>, %arg6: memref<1x32xf32, #tpu.memory_space<vmem>>, %arg7: memref<1x32xf32, #tpu.memory_space<vmem>>, %arg8: memref<32x32xbf16, #tpu.memory_space<vmem>>) attributes {dimension_semantics = [#tpu.dimension_semantics<parallel>], iteration_bounds = array<i64: 1>, scalar_prefetch = 0 : i64, scratch_operands = 0 : i64, tpu.core_type = #tpu.core_type<tc>, window_params = [{transform_indices = @transform_0, window_bounds = array<i64: 32, 32>}, {pipeline_mode = #tpu.pipeline_mode<synchronous>, transform_indices = @transform_1, window_bounds = array<i64: 32, 64>}, {pipeline_mode = #tpu.pipeline_mode<synchronous>, transform_indices = @transform_2, window_bounds = array<i64: 1, 64>}, {pipeline_mode = #tpu.pipeline_mode<synchronous>, transform_indices = @transform_3, window_bounds = array<i64: 64, 32>}, {pipeline_mode = #tpu.pipeline_mode<synchronous>, transform_indices = @transform_4, window_bounds = array<i64: 1, 32>}, {pipeline_mode = #tpu.pipeline_mode<synchronous>, transform_indices = @transform_5, window_bounds = array<i64: 1, 32>}, {pipeline_mode = #tpu.pipeline_mode<synchronous>, transform_indices = @transform_6, window_bounds = array<i64: 1, 32>}, {transform_indices = @transform_7, window_bounds = array<i64: 32, 32>}]} {
    %c0 = arith.constant 0 : index
    %c0_0 = arith.constant 0 : index
    %0 = vector.load %arg1[%c0, %c0_0] : memref<32x32xbf16, #tpu.memory_space<vmem>>, vector<32x32xbf16>
    %c0_1 = arith.constant 0 : index
    %c0_2 = arith.constant 0 : index
    %1 = vector.load %arg2[%c0_1, %c0_2] : memref<32x64xbf16, #tpu.memory_space<vmem>>, vector<32x64xbf16>
    %cst = arith.constant dense<0.000000e+00> : vector<32x64xf32>
    %2 = tpu.matmul %0, %1, %cst {dimension_numbers = #tpu.dot_dimension_numbers<[1], [0], [0], [1], [0, 0, 1, 1], [], []>} : vector<32x32xbf16>, vector<32x64xbf16>, vector<32x64xf32> -> vector<32x64xf32>
    %c0_3 = arith.constant 0 : index
    %c0_4 = arith.constant 0 : index
    %3 = vector.load %arg3[%c0_3, %c0_4] : memref<1x64xf32, #tpu.memory_space<vmem>>, vector<1x64xf32>
    %4 = vector.broadcast %3 : vector<1x64xf32> to vector<32x64xf32>
    %5 = arith.addf %2, %4 : vector<32x64xf32>
    %6 = arith.mulf %5, %5 : vector<32x64xf32>
    %7 = arith.mulf %5, %6 : vector<32x64xf32>
    %cst_5 = arith.constant 4.471500e-02 : f32
    %8 = vector.broadcast %cst_5 : f32 to vector<32x64xf32>
    %9 = arith.mulf %8, %7 : vector<32x64xf32>
    %10 = arith.addf %5, %9 : vector<32x64xf32>
    %cst_6 = arith.constant 0.797884583 : f32
    %11 = vector.broadcast %cst_6 : f32 to vector<32x64xf32>
    %12 = arith.mulf %11, %10 : vector<32x64xf32>
    %13 = math.tanh %12 : vector<32x64xf32>
    %cst_7 = arith.constant 1.000000e+00 : f32
    %14 = vector.broadcast %cst_7 : f32 to vector<32x64xf32>
    %15 = arith.addf %14, %13 : vector<32x64xf32>
    %cst_8 = arith.constant 5.000000e-01 : f32
    %16 = vector.broadcast %cst_8 : f32 to vector<32x64xf32>
    %17 = arith.mulf %16, %15 : vector<32x64xf32>
    %18 = arith.mulf %5, %17 : vector<32x64xf32>
    %19 = arith.truncf %18 : vector<32x64xf32> to vector<32x64xbf16>
    %c0_9 = arith.constant 0 : index
    %c0_10 = arith.constant 0 : index
    %20 = vector.load %arg4[%c0_9, %c0_10] : memref<64x32xbf16, #tpu.memory_space<vmem>>, vector<64x32xbf16>
    %cst_11 = arith.constant dense<0.000000e+00> : vector<32x32xf32>
    %21 = tpu.matmul %19, %20, %cst_11 {dimension_numbers = #tpu.dot_dimension_numbers<[1], [0], [0], [1], [0, 0, 1, 1], [], []>} : vector<32x64xbf16>, vector<64x32xbf16>, vector<32x32xf32> -> vector<32x32xf32>
    %c0_12 = arith.constant 0 : index
    %c0_13 = arith.constant 0 : index
    %22 = vector.load %arg5[%c0_12, %c0_13] : memref<1x32xf32, #tpu.memory_space<vmem>>, vector<1x32xf32>
    %23 = vector.broadcast %22 : vector<1x32xf32> to vector<32x32xf32>
    %24 = arith.addf %21, %23 : vector<32x32xf32>
    %c0_14 = arith.constant 0 : index
    %c0_15 = arith.constant 0 : index
    %25 = vector.load %arg1[%c0_14, %c0_15] : memref<32x32xbf16, #tpu.memory_space<vmem>>, vector<32x32xbf16>
    %26 = arith.extf %25 : vector<32x32xbf16> to vector<32x32xf32>
    %27 = arith.addf %24, %26 : vector<32x32xf32>
    %cst_16 = arith.constant dense<0.000000e+00> : vector<32xf32>
    %28 = vector.multi_reduction <add>, %27, %cst_16 [1] : vector<32x32xf32> to vector<32xf32>
    %29 = vector.shape_cast %28 : vector<32xf32> to vector<32x1xf32>
    %cst_17 = arith.constant 3.200000e+01 : f32
    %30 = vector.broadcast %cst_17 : f32 to vector<32x1xf32>
    %31 = arith.divf %29, %30 : vector<32x1xf32>
    %32 = vector.broadcast %31 : vector<32x1xf32> to vector<32x32xf32>
    %33 = arith.subf %27, %32 : vector<32x32xf32>
    %34 = arith.mulf %33, %33 : vector<32x32xf32>
    %cst_18 = arith.constant dense<0.000000e+00> : vector<32xf32>
    %35 = vector.multi_reduction <add>, %34, %cst_18 [1] : vector<32x32xf32> to vector<32xf32>
    %36 = vector.shape_cast %35 : vector<32xf32> to vector<32x1xf32>
    %cst_19 = arith.constant 3.200000e+01 : f32
    %37 = vector.broadcast %cst_19 : f32 to vector<32x1xf32>
    %38 = arith.divf %36, %37 : vector<32x1xf32>
    %39 = vector.broadcast %31 : vector<32x1xf32> to vector<32x32xf32>
    %40 = arith.subf %27, %39 : vector<32x32xf32>
    %cst_20 = arith.constant 9.99999974E-6 : f32
    %41 = vector.broadcast %cst_20 : f32 to vector<32x1xf32>
    %42 = arith.addf %38, %41 : vector<32x1xf32>
    %43 = math.rsqrt %42 : vector<32x1xf32>
    %44 = vector.broadcast %43 : vector<32x1xf32> to vector<32x32xf32>
    %45 = arith.mulf %40, %44 : vector<32x32xf32>
    %c0_21 = arith.constant 0 : index
    %c0_22 = arith.constant 0 : index
    %46 = vector.load %arg6[%c0_21, %c0_22] : memref<1x32xf32, #tpu.memory_space<vmem>>, vector<1x32xf32>
    %47 = vector.broadcast %46 : vector<1x32xf32> to vector<32x32xf32>
    %48 = arith.mulf %45, %47 : vector<32x32xf32>
    %c0_23 = arith.constant 0 : index
    %c0_24 = arith.constant 0 : index
    %49 = vector.load %arg7[%c0_23, %c0_24] : memref<1x32xf32, #tpu.memory_space<vmem>>, vector<1x32xf32>
    %50 = vector.broadcast %49 : vector<1x32xf32> to vector<32x32xf32>
    %51 = arith.addf %48, %50 : vector<32x32xf32>
    %52 = arith.truncf %51 : vector<32x32xf32> to vector<32x32xbf16>
    %c0_25 = arith.constant 0 : index
    %c0_26 = arith.constant 0 : index
    %53 = vector.load %arg8[%c0_25, %c0_26] : memref<32x32xbf16, #tpu.memory_space<vmem>>, vector<32x32xbf16>
    tpu.vector_store %arg8[%c0_25, %c0_26], %52 {strides = array<i32>} : memref<32x32xbf16, #tpu.memory_space<vmem>>, vector<32x32xbf16>,
    return
  }
  func.func @transform_0(%arg0: i32) -> (i32, i32) {
    %c0_i32 = arith.constant 0 : i32
    %c0_i32_0 = arith.constant 0 : i32
    return %arg0, %c0_i32 : i32, i32
  }
  func.func @transform_1(%arg0: i32) -> (i32, i32) {
    %c0_i32 = arith.constant 0 : i32
    %c0_i32_0 = arith.constant 0 : i32
    %c0_i32_1 = arith.constant 0 : i32
    return %c0_i32, %c0_i32_0 : i32, i32
  }
  func.func @transform_2(%arg0: i32) -> (i32, i32) {
    %c0_i32 = arith.constant 0 : i32
    %c0_i32_0 = arith.constant 0 : i32
    %c0_i32_1 = arith.constant 0 : i32
    return %c0_i32, %c0_i32_0 : i32, i32
  }
  func.func @transform_3(%arg0: i32) -> (i32, i32) {
    %c0_i32 = arith.constant 0 : i32
    %c0_i32_0 = arith.constant 0 : i32
    %c0_i32_1 = arith.constant 0 : i32
    return %c0_i32, %c0_i32_0 : i32, i32
  }
  func.func @transform_4(%arg0: i32) -> (i32, i32) {
    %c0_i32 = arith.constant 0 : i32
    %c0_i32_0 = arith.constant 0 : i32
    %c0_i32_1 = arith.constant 0 : i32
    return %c0_i32, %c0_i32_0 : i32, i32
  }
  func.func @transform_5(%arg0: i32) -> (i32, i32) {
    %c0_i32 = arith.constant 0 : i32
    %c0_i32_0 = arith.constant 0 : i32
    %c0_i32_1 = arith.constant 0 : i32
    return %c0_i32, %c0_i32_0 : i32, i32
  }
  func.func @transform_6(%arg0: i32) -> (i32, i32) {
    %c0_i32 = arith.constant 0 : i32
    %c0_i32_0 = arith.constant 0 : i32
    %c0_i32_1 = arith.constant 0 : i32
    return %c0_i32, %c0_i32_0 : i32, i32
  }
  func.func @transform_7(%arg0: i32) -> (i32, i32) {
    %c0_i32 = arith.constant 0 : i32
    %c0_i32_0 = arith.constant 0 : i32
    return %arg0, %c0_i32 : i32, i32
  }
}

module attributes {stable_mosaic.version = 11 : i64} {
  func.func @kernel(%arg0: i32, %arg1: memref<32x32xbf16, #tpu.memory_space<vmem>>, %arg2: memref<32x128xbf16, #tpu.memory_space<vmem>>, %arg3: memref<1x128xf32, #tpu.memory_space<vmem>>, %arg4: memref<32x128xf32, #tpu.memory_space<vmem>>) attributes {dimension_semantics = [#tpu.dimension_semantics<parallel>], iteration_bounds = array<i64: 1>, scalar_prefetch = 0 : i64, scratch_operands = 0 : i64, tpu.core_type = #tpu.core_type<tc>, window_params = [{transform_indices = @transform_0, window_bounds = array<i64: 32, 32>}, {pipeline_mode = #tpu.pipeline_mode<synchronous>, transform_indices = @transform_1, window_bounds = array<i64: 32, 128>}, {pipeline_mode = #tpu.pipeline_mode<synchronous>, transform_indices = @transform_2, window_bounds = array<i64: 1, 128>}, {transform_indices = @transform_3, window_bounds = array<i64: 32, 128>}]} {
    %c0 = arith.constant 0 : index
    %c0_0 = arith.constant 0 : index
    %0 = vector.load %arg1[%c0, %c0_0] : memref<32x32xbf16, #tpu.memory_space<vmem>>, vector<32x32xbf16>
    %c0_1 = arith.constant 0 : index
    %c0_2 = arith.constant 0 : index
    %1 = vector.load %arg2[%c0_1, %c0_2] : memref<32x128xbf16, #tpu.memory_space<vmem>>, vector<32x128xbf16>
    %cst = arith.constant dense<0.000000e+00> : vector<32x128xf32>
    %2 = tpu.matmul %0, %1, %cst {dimension_numbers = #tpu.dot_dimension_numbers<[1], [0], [0], [1], [0, 0, 1, 1], [], []>} : vector<32x32xbf16>, vector<32x128xbf16>, vector<32x128xf32> -> vector<32x128xf32>
    %c0_3 = arith.constant 0 : index
    %c0_4 = arith.constant 0 : index
    %3 = vector.load %arg3[%c0_3, %c0_4] : memref<1x128xf32, #tpu.memory_space<vmem>>, vector<1x128xf32>
    %4 = vector.broadcast %3 : vector<1x128xf32> to vector<32x128xf32>
    %5 = arith.addf %2, %4 : vector<32x128xf32>
    %c0_5 = arith.constant 0 : index
    %c0_6 = arith.constant 0 : index
    %6 = vector.load %arg4[%c0_5, %c0_6] : memref<32x128xf32, #tpu.memory_space<vmem>>, vector<32x128xf32>
    tpu.vector_store %arg4[%c0_5, %c0_6], %5 {strides = array<i32>} : memref<32x128xf32, #tpu.memory_space<vmem>>, vector<32x128xf32>,
    return
  }
  func.func @transform_0(%arg0: i32) -> (i32, i32) {
    %c0_i32 = arith.constant 0 : i32
    %c0_i32_0 = arith.constant 0 : i32
    return %arg0, %c0_i32 : i32, i32
  }
  func.func @transform_1(%arg0: i32) -> (i32, i32) {
    %c0_i32 = arith.constant 0 : i32
    %c0_i32_0 = arith.constant 0 : i32
    %c0_i32_1 = arith.constant 0 : i32
    return %c0_i32, %c0_i32_0 : i32, i32
  }
  func.func @transform_2(%arg0: i32) -> (i32, i32) {
    %c0_i32 = arith.constant 0 : i32
    %c0_i32_0 = arith.constant 0 : i32
    %c0_i32_1 = arith.constant 0 : i32
    return %c0_i32, %c0_i32_0 : i32, i32
  }
  func.func @transform_3(%arg0: i32) -> (i32, i32) {
    %c0_i32 = arith.constant 0 : i32
    %c0_i32_0 = arith.constant 0 : i32
    return %arg0, %c0_i32 : i32, i32
  }
}

</mosaic_0001>

<bundles_post_ra>
// kernel: forward.8
= control target key start
LH: loop header
LB: loop body
LE: loop exit
PB: predicated region body
PF: predicated region fallthrough
CT: control target
= control target key end

     0   :  { %vm18_vm0 = vcmask 261120   ;;  %vm110_vm1 = vcmask 257024   ;;  %s199_s0 = inlined_call_operand.vmem [shape: f32[32,32], index: 0, kind: input, shape index: {}]   ;;  %s200_s1 = inlined_call_operand.vmem [shape: f32[1,32], index: 1, kind: input, shape index: {}]   ;;  %s201_s2 = inlined_call_operand.vmem [shape: f32[1,32], index: 2, kind: input, shape index: {}]   ;;  %s202_s3 = inlined_call_operand.vmem [shape: bf16[32,32], index: 3, kind: output, shape index: {}]  }
   0x1   :  { %v14_v0 = vld [vmem:[%s199_s0] sm:$0xff]  ;;  %v16_v1 = vld [vmem:[%s199_s0 + $0x10] sm:$0xff]  ;;  %v15_v2 = vld [vmem:[%s199_s0 + $0x8] sm:$0xff] }
   0x2   :  { %v19_v3 = vsel %vm18_vm0, %v14_v0, 0.0  ;;  %v25_v4 = vsel %vm18_vm0, %v16_v1, 0.0  ;;  %v17_v5 = vld [vmem:[%s199_s0 + $0x18] sm:$0xff]  ;;  %v22_v6 = vsel %vm18_vm0, %v15_v2, 0.0  ;;  %v119_v41 = vld [vmem:[%s200_s1] ss:$0 sm:$0xff] }
   0x3   :  { %20 = vadd.xlane.f32.xlu0 %v19_v3  ;;  %26 = vadd.xlane.f32.xlu1 %v25_v4  ;;  %v28_v7 = vsel %vm18_vm0, %v17_v5, 0.0  ;;  %v120_v43 = vld [vmem:[%s201_s2] ss:$0 sm:$0xff] }
   0x7   :  { %23 = vadd.xlane.f32.xlu0 %v22_v6  ;;  %29 = vadd.xlane.f32.xlu1 %v28_v7 }
  0x8c   :  { %v21_v8 = vpop.xlane.xlu0 %20  ;;  %v27_v9 = vpop.xlane.xlu1 %26 }
  0x8d   :  { %v32_v10 = vmul.f32 0.03125, %v21_v8  ;;  %v34_v11 = vmul.f32 0.03125, %v27_v9 }
  0x8f   :  { %v36_v12 = vsub.f32 %v14_v0, %v32_v10  ;;  %v38_v13 = vsub.f32 %v16_v1, %v34_v11 }
  0x90   :  { %v24_v14 = vpop.xlane.xlu0 %23  ;;  %v30_v15 = vpop.xlane.xlu1 %29 }
  0x91   :  { %v33_v16 = vmul.f32 0.03125, %v24_v14  ;;  %v35_v17 = vmul.f32 0.03125, %v30_v15  ;;  %v40_v18 = vmul.f32 %v36_v12, %v36_v12  ;;  %v42_v19 = vmul.f32 %v38_v13, %v38_v13 }
  0x93   :  { %v37_v20 = vsub.f32 %v15_v2, %v33_v16  ;;  %v39_v21 = vsub.f32 %v17_v5, %v35_v17  ;;  %v44_v22 = vsel %vm18_vm0, %v40_v18, 0.0  ;;  %v50_v23 = vsel %vm18_vm0, %v42_v19, 0.0 }
  0x94   :  { %45 = vadd.xlane.f32.xlu0 %v44_v22 }
  0x95   :  { %v41_v24 = vmul.f32 %v37_v20, %v37_v20  ;;  %v43_v25 = vmul.f32 %v39_v21, %v39_v21 }
  0x97   :  { %v47_v26 = vsel %vm18_vm0, %v41_v24, 0.0  ;;  %v53_v27 = vsel %vm18_vm0, %v43_v25, 0.0 }
  0x98   :  { %51 = vadd.xlane.f32.xlu0 %v50_v23  ;;  %48 = vadd.xlane.f32.xlu1 %v47_v26 }
  0x9c   :  { %54 = vadd.xlane.f32.xlu1 %v53_v27 }
 0x11d   :  { %v46_v28 = vpop.xlane.xlu0 %45 }
 0x11e   :  { %v56_v29 = vmul.f32 0.03125, %v46_v28 }
 0x120   :  { %v60_v30 = vadd.f32 1e-05, %v56_v29 }
 0x121   :  { %v49_v31 = vpop.xlane.xlu1 %48  ;;  %v52_v32 = vpop.xlane.xlu0 %51 }
 0x122   :  { %129 = vrsqrt.f32 %v60_v30  ;;  %v57_v33 = vmul.f32 0.03125, %v49_v31  ;;  %v58_v34 = vmul.f32 0.03125, %v52_v32 }
 0x124   :  { %v61_v35 = vadd.f32 1e-05, %v57_v33  ;;  %v62_v36 = vadd.f32 1e-05, %v58_v34 }
 0x125   :  { %v55_v37 = vpop.xlane.xlu1 %54 }
 0x126   :  { %131 = vrsqrt.f32 %v61_v35  ;;  %v59_v38 = vmul.f32 0.03125, %v55_v37 }
 0x127   :  { %133 = vrsqrt.f32 %v62_v36 }
 0x128   :  { %v63_v39 = vadd.f32 1e-05, %v59_v38 }
 0x12a   :  { %135 = vrsqrt.f32 %v63_v39 }
 0x12f   :  { %v130_v40 = vpop.eup %129 }
 0x130   :  { %v68_v42 = vmul.f32 %v130_v40, %v36_v12 }
 0x132   :  { %v79_v44 = vmul.f32 %v119_v41, %v68_v42 }
 0x133   :  { %v132_v45 = vpop.eup %131 }
 0x134   :  { %v134_v46 = vpop.eup %133  ;;  %v90_v47 = vadd.f32 %v120_v43, %v79_v44  ;;  %v69_v48 = vmul.f32 %v132_v45, %v37_v20 }
 0x135   :  { %v70_v49 = vmul.f32 %v134_v46, %v38_v13 }
 0x136   :  { %v125_v50 = vpack.c.bf16 %v90_v47, %v90_v47  ;;  %v80_v51 = vmul.f32 %v119_v41, %v69_v48 }
 0x137   :  { %v136_v52 = vpop.eup %135  ;;  %v81_v53 = vmul.f32 %v119_v41, %v70_v49 }
 0x138   :  { %111 = vst.msk [vmem:[%s202_s3] sm:$0xf] %vm110_vm1, %v125_v50  ;;  %v91_v54 = vadd.f32 %v120_v43, %v80_v51  ;;  %v71_v55 = vmul.f32 %v136_v52, %v39_v21 }
 0x139   :  { %v92_v56 = vadd.f32 %v120_v43, %v81_v53 }
 0x13a   :  { %v126_v57 = vpack.c.bf16 %v91_v54, %v91_v54  ;;  %v82_v58 = vmul.f32 %v119_v41, %v71_v55 }
 0x13b   :  { %v127_v59 = vpack.c.bf16 %v92_v56, %v92_v56 }
 0x13c   :  { %112 = vst.msk [vmem:[%s202_s3 + $0x4] sm:$0xf] %vm110_vm1, %v126_v57  ;;  %v93_v60 = vadd.f32 %v120_v43, %v82_v58 }
 0x13d   :  { %113 = vst.msk [vmem:[%s202_s3 + $0x8] sm:$0xf] %vm110_vm1, %v127_v59 }
 0x13e   :  { %v128_v61 = vpack.c.bf16 %v93_v60, %v93_v60 }
 0x140   :  { %114 = vst.msk [vmem:[%s202_s3 + $0xc] sm:$0xf] %vm110_vm1, %v128_v61 }

// kernel: forward.9
= control target key start
LH: loop header
LB: loop body
LE: loop exit
PB: predicated region body
PF: predicated region fallthrough
CT: control target
= control target key end

     0   :  { %vm52_vm0 = vcmask 261120   ;;  %vm124_vm1 = vcmask 781312   ;;  %s211_s1 = inlined_call_operand.vmem [shape: bf16[32,96], index: 1, kind: input, shape index: {}]   ;;  %s212_s0 = inlined_call_operand.vmem [shape: bf16[32,32], index: 0, kind: input, shape index: {}]   ;;  %s213_s2 = inlined_call_operand.vmem [shape: f32[1,96], index: 2, kind: input, shape index: {}]   ;;  %s214_s3 = inlined_call_operand.vmem [shape: bf16[32,96], index: 3, kind: output, shape index: {}]  }
   0x1   :  { %v160_v0 = vld [vmem:[%s211_s1 + $0x8] sm:$0xff]   ;;  %v161_v1 = vld [vmem:[%s211_s1] sm:$0xff]  }
   0x2   :  { %152 = vmatprep.subr.bf16.mxu0 %v160_v0  ;;  %v162_v2 = vld [vmem:[%s212_s0] sm:$0xff]   ;;  %v163_v3 = vld [vmem:[%s212_s0 + $0x8] sm:$0xff]  }
   0x3   :  { %153 = vmatpush3.bf16.msra.mxu0 %v160_v0  ;;  %156 = vmatprep.mubr.msk.bf16.mxu0 %vm52_vm0, %v162_v2  ;;  %v133_v4 = vld [vmem:[%s213_s2] ss:$0 sm:$0xff] }
   0x4   :  { %154 = vmatprep.subr.bf16.mxu0 %v161_v1 }
   0x7   :  { %155 = vmatpush3.bf16.msra.mxu0 %v161_v1 }
   0xa   :  { %157 = vmatmul.mubr.msk.bf16.vlgmr.msra.gmra.mxu0 %vm52_vm0, %v163_v3 }
  0xca   :  { %v158_v5 = vpop.f32.mrf.mxu0 }
  0xcb   :  { %v102_v6 = vadd.f32 %v158_v5, %v133_v4 }
  0xcc   :  { %v93_v7 = vpop.f32.mrf.mxu0 }
  0xcd   :  { %v146_v8 = vpack.c.bf16 %v102_v6, %v102_v6  ;;  %v94_v9 = vadd.f32 %v133_v4, %v93_v7 }
  0xce   :  { %v159_v10 = vpop.f32.mrf.mxu0 }
  0xcf   :  { %127 = vst.msk [vmem:[%s214_s3 + $0x8] sm:$0xf] %vm124_vm1, %v146_v8  ;;  %v144_v11 = vpack.c.bf16 %v94_v9, %v94_v9  ;;  %v105_v12 = vadd.f32 %v159_v10, %v133_v4 }
  0xd0   :  { %v96_v13 = vpop.f32.mrf.mxu0 }
  0xd1   :  { %125 = vst.msk [vmem:[%s214_s3] sm:$0xf] %vm124_vm1, %v144_v11  ;;  %v147_v14 = vpack.c.bf16 %v105_v12, %v105_v12  ;;  %v97_v15 = vadd.f32 %v133_v4, %v96_v13 }
  0xd3   :  { %128 = vst.msk [vmem:[%s214_s3 + $0xc] sm:$0xf] %vm124_vm1, %v147_v14  ;;  %v145_v16 = vpack.c.bf16 %v97_v15, %v97_v15 }
  0xd5   :  { %126 = vst.msk [vmem:[%s214_s3 + $0x4] sm:$0xf] %vm124_vm1, %v145_v16 }

// kernel: forward.11
= control target key start
LH: loop header
LB: loop body
LE: loop exit
PB: predicated region body
PF: predicated region fallthrough
CT: control target
= control target key end

     0   :  { %vm64_vm0 = vcmask 261120   ;;  %vm197_vm1 = vcmask 523264   ;;  %vm352_vm2 = vcmask 257024   ;;  %s553_s1 = inlined_call_operand.vmem [shape: bf16[32,64], index: 1, kind: input, shape index: {}]   ;;  %s554_s0 = inlined_call_operand.vmem [shape: bf16[32,32], index: 0, kind: input, shape index: {}]   ;;  %s555_s3 = inlined_call_operand.vmem [shape: bf16[64,32], index: 3, kind: input, shape index: {}]   ;;  %s556_s2 = inlined_call_operand.vmem [shape: f32[1,64], index: 2, kind: input, shape index: {}]   ;;  %s557_s4 = inlined_call_operand.vmem [shape: f32[1,32], index: 4, kind: input, shape index: {}]   ;;  %s558_s5 = inlined_call_operand.vmem [shape: f32[1,32], index: 5, kind: input, shape index: {}]   ;;  %s559_s6 = inlined_call_operand.vmem [shape: f32[1,32], index: 6, kind: input, shape index: {}]   ;;  %s560_s7 = inlined_call_operand.vmem [shape: bf16[32,32], index: 7, kind: output, shape index: {}]  }
   0x1   :  { %v415_v0 = vld [vmem:[%s553_s1 + $0x8] sm:$0xff]   ;;  %v416_v1 = vld [vmem:[%s553_s1] sm:$0xff]   ;;  %v419_v4 = vld [vmem:[%s555_s3 + $0x18] sm:$0xff]  }
   0x2   :  { %395 = vmatprep.subr.bf16.mxu0 %v415_v0  ;;  %v490_v2 = vld [vmem:[%s554_s0] sm:$0xff]   ;;  %v495_v3 = vld [vmem:[%s554_s0 + $0x8] sm:$0xff]   ;;  %403 = vmatprep.subr.bf16.mxu1 %v419_v4  ;;  %v420_v5 = vld [vmem:[%s555_s3 + $0x10] sm:$0xff]  }
   0x3   :  { %396 = vmatpush3.bf16.msra.mxu0 %v415_v0  ;;  %399 = vmatprep.mubr.msk.bf16.mxu0 %vm64_vm0, %v490_v2  ;;  %v421_v6 = vld [vmem:[%s555_s3 + $0x8] sm:$0xff]   ;;  %v422_v7 = vld [vmem:[%s555_s3] sm:$0xff]   ;;  %v255_v56 = vunpack.c.l.bf16 %v495_v3  ;;  %v253_v58 = vunpack.c.l.bf16 %v490_v2  ;;  %v256_v63 = vunpack.c.h.bf16 %v495_v3 }
   0x4   :  { %397 = vmatprep.subr.bf16.mxu0 %v416_v1  ;;  %404 = vmatpush3.bf16.msra.mxu1 %v419_v4  ;;  %v361_v8 = vld [vmem:[%s556_s2] ss:$0 sm:$0xff] }
   0x5   :  { %405 = vmatprep.subr.bf16.mxu1 %v420_v5  ;;  %v368_v55 = vld [vmem:[%s557_s4] ss:$0 sm:$0xff] }
   0x7   :  { %398 = vmatpush3.bf16.msra.mxu0 %v416_v1  ;;  %v254_v1 = vunpack.c.h.bf16 %v490_v2 }
   0x8   :  { %406 = vmatpush3.bf16.msra.mxu1 %v420_v5 }
   0x9   :  { %407 = vmatprep.subr.bf16.mxu1 %v421_v6 }
   0xa   :  { %400 = vmatmul.mubr.msk.bf16.vlgmr.msra.gmra.mxu0 %vm64_vm0, %v495_v3 }
   0xc   :  { %408 = vmatpush3.bf16.msra.mxu1 %v421_v6 }
   0xd   :  { %409 = vmatprep.subr.bf16.mxu1 %v422_v7 }
  0x10   :  { %410 = vmatpush3.bf16.msra.mxu1 %v422_v7 }
  0xca   :  { %v401_v9 = vpop.f32.mrf.mxu0 }
  0xcb   :  { %v114_v10 = vadd.f32 %v401_v9, %v361_v8 }
  0xcc   :  { %v105_v11 = vpop.f32.mrf.mxu0 }
  0xcd   :  { %v122_v12 = vmul.f32 %v114_v10, %v114_v10  ;;  %v106_v13 = vadd.f32 %v361_v8, %v105_v11 }
  0xce   :  { %v402_v14 = vpop.f32.mrf.mxu0 }
  0xcf   :  { %v126_v15 = vmul.f32 %v122_v12, %v114_v10  ;;  %v120_v16 = vmul.f32 %v106_v13, %v106_v13  ;;  %v117_v17 = vadd.f32 %v402_v14, %v361_v8 }
  0xd0   :  { %v108_v18 = vpop.f32.mrf.mxu0 }
  0xd1   :  { %v130_v19 = vmul.f32 0.044715, %v126_v15  ;;  %v124_v20 = vmul.f32 %v120_v16, %v106_v13  ;;  %v123_v21 = vmul.f32 %v117_v17, %v117_v17  ;;  %v109_v22 = vadd.f32 %v361_v8, %v108_v18 }
  0xd3   :  { %v134_v23 = vadd.f32 %v130_v19, %v114_v10  ;;  %v128_v24 = vmul.f32 0.044715, %v124_v20  ;;  %v127_v25 = vmul.f32 %v123_v21, %v117_v17  ;;  %v121_v26 = vmul.f32 %v109_v22, %v109_v22 }
  0xd5   :  { %v138_v27 = vmul.f32 0.7978846, %v134_v23  ;;  %v132_v28 = vadd.f32 %v128_v24, %v106_v13  ;;  %v131_v29 = vmul.f32 0.044715, %v127_v25  ;;  %v125_v30 = vmul.f32 %v121_v26, %v109_v22 }
  0xd7   :  { %v136_v31 = vmul.f32 0.7978846, %v132_v28  ;;  %v135_v32 = vadd.f32 %v131_v29, %v117_v17  ;;  %v129_v33 = vmul.f32 0.044715, %v125_v30  ;;  %425 = vtanh.f32 %v138_v27 }
  0xd9   :  { %v139_v34 = vmul.f32 0.7978846, %v135_v32  ;;  %v133_v35 = vadd.f32 %v129_v33, %v109_v22  ;;  %427 = vtanh.f32 %v136_v31 }
  0xdb   :  { %429 = vtanh.f32 %v139_v34  ;;  %v137_v36 = vmul.f32 0.7978846, %v133_v35 }
  0xdd   :  { %431 = vtanh.f32 %v137_v36 }
  0xe4   :  { %v426_v37 = vpop.eup %425 }
  0xe5   :  { %v146_v41 = vadd.f32 1.0, %v426_v37 }
  0xe6   :  { %v428_v38 = vpop.eup %427 }
  0xe7   :  { %v144_v39 = vadd.f32 1.0, %v428_v38  ;;  %v150_v47 = vmul.f32 0.5, %v146_v41 }
  0xe8   :  { %v430_v40 = vpop.eup %429 }
  0xe9   :  { %v147_v42 = vadd.f32 1.0, %v430_v40  ;;  %v148_v46 = vmul.f32 0.5, %v144_v39  ;;  %v154_v52 = vmul.f32 %v150_v47, %v114_v10  ;;  %v376_v47 = vld [vmem:[%s559_s6] ss:$0 sm:$0xff] }
  0xea   :  { %v432_v43 = vpop.eup %431 }
  0xeb   :  { %v151_v44 = vmul.f32 0.5, %v147_v42  ;;  %v145_v45 = vadd.f32 1.0, %v432_v43  ;;  %v152_v50 = vmul.f32 %v148_v46, %v106_v13 }
  0xed   :  { %v149_v48 = vmul.f32 0.5, %v145_v45  ;;  %v155_v49 = vmul.f32 %v151_v44, %v117_v17  ;;  %v375_v45 = vld [vmem:[%s558_s5] ss:$0 sm:$0xff] }
  0xef   :  { %v153_v51 = vmul.f32 %v149_v48, %v109_v22  ;;  %v157_v54 = vpack.c.bf16 %v155_v49, %v154_v52 }
  0xf1   :  { %v156_v53 = vpack.c.bf16 %v153_v51, %v152_v50 }
  0xf3   :  { %411 = vmatprep.mubr.msk.bf16.mxu1 %vm197_vm1, %v156_v53 }
  0xf4   :  { %412 = vmatmul.mubr.msk.bf16.vlgmr.msra.gmra.mxu1 %vm197_vm1, %v157_v54 }
 0x1b4   :  { %v413_v57 = vpop.f32.mrf.mxu1 }
 0x1b5   :  { %v247_v59 = vadd.f32 %v413_v57, %v368_v55 }
 0x1b6   :  { %v238_v60 = vpop.f32.mrf.mxu1 }
 0x1b7   :  { %v239_v61 = vadd.f32 %v368_v55, %v238_v60  ;;  %v259_v62 = vadd.f32 %v255_v56, %v247_v59 }
 0x1b8   :  { %v414_v0 = vpop.f32.mrf.mxu1 }
 0x1b9   :  { %v250_v4 = vadd.f32 %v414_v0, %v368_v55  ;;  %v267_v5 = vsel %vm64_vm0, %v259_v62, 0.0  ;;  %v257_v6 = vadd.f32 %v253_v58, %v239_v61 }
 0x1ba   :  { %268 = vadd.xlane.f32.xlu1 %v267_v5  ;;  %v241_v7 = vpop.f32.mrf.mxu1 }
 0x1bb   :  { %v242_v8 = vadd.f32 %v368_v55, %v241_v7  ;;  %v261_v9 = vsel %vm64_vm0, %v257_v6, 0.0  ;;  %v260_v10 = vadd.f32 %v256_v63, %v250_v4 }
 0x1bc   :  { %262 = vadd.xlane.f32.xlu0 %v261_v9 }
 0x1bd   :  { %v270_v11 = vsel %vm64_vm0, %v260_v10, 0.0  ;;  %v258_v12 = vadd.f32 %v254_v1, %v242_v8 }
 0x1be   :  { %271 = vadd.xlane.f32.xlu1 %v270_v11 }
 0x1bf   :  { %v264_v3 = vsel %vm64_vm0, %v258_v12, 0.0 }
 0x1c0   :  { %265 = vadd.xlane.f32.xlu0 %v264_v3 }
 0x243   :  { %v269_v13 = vpop.xlane.xlu1 %268 }
 0x244   :  { %v276_v2 = vmul.f32 0.03125, %v269_v13 }
 0x245   :  { %v263_v14 = vpop.xlane.xlu0 %262 }
 0x246   :  { %v274_v15 = vmul.f32 0.03125, %v263_v14  ;;  %v280_v17 = vsub.f32 %v259_v62, %v276_v2 }
 0x247   :  { %v272_v16 = vpop.xlane.xlu1 %271 }
 0x248   :  { %v278_v18 = vsub.f32 %v257_v6, %v274_v15  ;;  %v277_v19 = vmul.f32 0.03125, %v272_v16  ;;  %v284_v26 = vmul.f32 %v280_v17, %v280_v17 }
 0x249   :  { %v266_v20 = vpop.xlane.xlu0 %265 }
 0x24a   :  { %v275_v21 = vmul.f32 0.03125, %v266_v20  ;;  %v282_v22 = vmul.f32 %v278_v18, %v278_v18  ;;  %v281_v23 = vsub.f32 %v260_v10, %v277_v19  ;;  %v292_v28 = vsel %vm64_vm0, %v284_v26, 0.0 }
 0x24c   :  { %v279_v24 = vsub.f32 %v258_v12, %v275_v21  ;;  %v286_v25 = vsel %vm64_vm0, %v282_v22, 0.0  ;;  %v285_v30 = vmul.f32 %v281_v23, %v281_v23 }
 0x24d   :  { %287 = vadd.xlane.f32.xlu0 %v286_v25 }
 0x24e   :  { %v283_v27 = vmul.f32 %v279_v24, %v279_v24  ;;  %v295_v31 = vsel %vm64_vm0, %v285_v30, 0.0 }
 0x250   :  { %v289_v29 = vsel %vm64_vm0, %v283_v27, 0.0 }
 0x251   :  { %293 = vadd.xlane.f32.xlu0 %v292_v28  ;;  %290 = vadd.xlane.f32.xlu1 %v289_v29 }
 0x255   :  { %296 = vadd.xlane.f32.xlu1 %v295_v31 }
 0x2d6   :  { %v288_v32 = vpop.xlane.xlu0 %287 }
 0x2d7   :  { %v298_v33 = vmul.f32 0.03125, %v288_v32 }
 0x2d9   :  { %v302_v34 = vadd.f32 1e-05, %v298_v33 }
 0x2da   :  { %v291_v35 = vpop.xlane.xlu1 %290  ;;  %v294_v36 = vpop.xlane.xlu0 %293 }
 0x2db   :  { %433 = vrsqrt.f32 %v302_v34  ;;  %v299_v37 = vmul.f32 0.03125, %v291_v35  ;;  %v300_v38 = vmul.f32 0.03125, %v294_v36 }
 0x2dd   :  { %v303_v39 = vadd.f32 1e-05, %v299_v37  ;;  %v304_v40 = vadd.f32 1e-05, %v300_v38 }
 0x2de   :  { %v297_v41 = vpop.xlane.xlu1 %296 }
 0x2df   :  { %435 = vrsqrt.f32 %v303_v39  ;;  %v301_v42 = vmul.f32 0.03125, %v297_v41 }
 0x2e0   :  { %437 = vrsqrt.f32 %v304_v40 }
 0x2e1   :  { %v305_v43 = vadd.f32 1e-05, %v301_v42 }
 0x2e3   :  { %439 = vrsqrt.f32 %v305_v43 }
 0x2e8   :  { %v434_v44 = vpop.eup %433 }
 0x2e9   :  { %v310_v46 = vmul.f32 %v434_v44, %v278_v18 }
 0x2eb   :  { %v321_v48 = vmul.f32 %v375_v45, %v310_v46 }
 0x2ec   :  { %v436_v49 = vpop.eup %435 }
 0x2ed   :  { %v438_v50 = vpop.eup %437  ;;  %v332_v51 = vadd.f32 %v376_v47, %v321_v48  ;;  %v311_v52 = vmul.f32 %v436_v49, %v279_v24 }
 0x2ee   :  { %v312_v53 = vmul.f32 %v438_v50, %v280_v17 }
 0x2ef   :  { %v381_v54 = vpack.c.bf16 %v332_v51, %v332_v51  ;;  %v322_v55 = vmul.f32 %v375_v45, %v311_v52 }
 0x2f0   :  { %v440_v56 = vpop.eup %439  ;;  %v323_v57 = vmul.f32 %v375_v45, %v312_v53 }
 0x2f1   :  { %353 = vst.msk [vmem:[%s560_s7] sm:$0xf] %vm352_vm2, %v381_v54  ;;  %v333_v58 = vadd.f32 %v376_v47, %v322_v55  ;;  %v313_v59 = vmul.f32 %v440_v56, %v281_v23 }
 0x2f2   :  { %v334_v60 = vadd.f32 %v376_v47, %v323_v57 }
 0x2f3   :  { %v382_v61 = vpack.c.bf16 %v333_v58, %v333_v58  ;;  %v324_v62 = vmul.f32 %v375_v45, %v313_v59 }
 0x2f4   :  { %v383_v63 = vpack.c.bf16 %v334_v60, %v334_v60 }
 0x2f5   :  { %354 = vst.msk [vmem:[%s560_s7 + $0x4] sm:$0xf] %vm352_vm2, %v382_v61  ;;  %v335_v0 = vadd.f32 %v376_v47, %v324_v62 }
 0x2f6   :  { %355 = vst.msk [vmem:[%s560_s7 + $0x8] sm:$0xf] %vm352_vm2, %v383_v63 }
 0x2f7   :  { %v384_v1 = vpack.c.bf16 %v335_v0, %v335_v0 }
 0x2f9   :  { %356 = vst.msk [vmem:[%s560_s7 + $0xc] sm:$0xf] %vm352_vm2, %v384_v1 }

// kernel: forward.15
= control target key start
LH: loop header
LB: loop body
LE: loop exit
PB: predicated region body
PF: predicated region fallthrough
CT: control target
= control target key end

     0   :  { %vm52_vm0 = vcmask 261120   ;;  %s186_s1 = inlined_call_operand.vmem [shape: bf16[32,128], index: 1, kind: input, shape index: {}]   ;;  %s187_s0 = inlined_call_operand.vmem [shape: bf16[32,32], index: 0, kind: input, shape index: {}]   ;;  %s188_s2 = inlined_call_operand.vmem [shape: f32[1,128], index: 2, kind: input, shape index: {}]   ;;  %s189_s3 = inlined_call_operand.vmem [shape: f32[32,128], index: 3, kind: output, shape index: {}]  }
   0x1   :  { %v135_v0 = vld [vmem:[%s186_s1 + $0x8] sm:$0xff]   ;;  %v136_v1 = vld [vmem:[%s186_s1] sm:$0xff]  }
   0x2   :  { %127 = vmatprep.subr.bf16.mxu0 %v135_v0  ;;  %v137_v2 = vld [vmem:[%s187_s0] sm:$0xff]   ;;  %v138_v3 = vld [vmem:[%s187_s0 + $0x8] sm:$0xff]  }
   0x3   :  { %128 = vmatpush3.bf16.msra.mxu0 %v135_v0  ;;  %131 = vmatprep.mubr.msk.bf16.mxu0 %vm52_vm0, %v137_v2  ;;  %v116_v4 = vld [vmem:[%s188_s2] ss:$0 sm:$0xff] }
   0x4   :  { %129 = vmatprep.subr.bf16.mxu0 %v136_v1 }
   0x7   :  { %130 = vmatpush3.bf16.msra.mxu0 %v136_v1 }
   0xa   :  { %132 = vmatmul.mubr.msk.bf16.vlgmr.msra.gmra.mxu0 %vm52_vm0, %v138_v3 }
  0xca   :  { %v133_v5 = vpop.f32.mrf.mxu0 }
  0xcb   :  { %v102_v6 = vadd.f32 %v133_v5, %v116_v4 }
  0xcc   :  { %v93_v7 = vpop.f32.mrf.mxu0 }
  0xcd   :  { %110 = vst [vmem:[%s189_s3 + $0x10] sm:$0xff] %v102_v6  ;;  %v94_v8 = vadd.f32 %v116_v4, %v93_v7 }
  0xce   :  { %v134_v9 = vpop.f32.mrf.mxu0 }
  0xcf   :  { %108 = vst [vmem:[%s189_s3] sm:$0xff] %v94_v8  ;;  %v105_v10 = vadd.f32 %v134_v9, %v116_v4 }
  0xd0   :  { %v96_v11 = vpop.f32.mrf.mxu0 }
  0xd1   :  { %111 = vst [vmem:[%s189_s3 + $0x18] sm:$0xff] %v105_v10  ;;  %v97_v12 = vadd.f32 %v116_v4, %v96_v11 }
  0xd3   :  { %109 = vst [vmem:[%s189_s3 + $0x8] sm:$0xff] %v97_v12 }

// kernel: forward.10
= control target key start
LH: loop header
LB: loop body
LE: loop exit
PB: predicated region body
PF: predicated region fallthrough
CT: control target
= control target key end

     0   :  { %s2006_s0 = inlined_call_operand.vmem [shape: bf16[2,2,16,16], index: 0, kind: input, shape index: {}]   ;;  %s2007_s1 = inlined_call_operand.vmem [shape: bf16[2,2,16,16], index: 1, kind: input, shape index: {}]   ;;  %s2008_s2 = inlined_call_operand.vmem [shape: bf16[2,2,16,16], index: 2, kind: input, shape index: {}]   ;;  %s2009_s3 = inlined_call_operand.vmem [shape: f32[2,2,1,8], index: 3, kind: input, shape index: {}]   ;;  %s2010_s4 = inlined_call_operand.vmem [shape: bf16[2,16,32], index: 4, kind: input, shape index: {}]   ;;  %s2011_s5 = inlined_call_operand.vmem [shape: bf16[32,32], index: 5, kind: input, shape index: {}]   ;;  %s2012_s6 = inlined_call_operand.vmem [shape: f32[1,32], index: 6, kind: input, shape index: {}]   ;;  %s2013_s7 = inlined_call_operand.vmem [shape: f32[1,32], index: 7, kind: input, shape index: {}]   ;;  %s2014_s8 = inlined_call_operand.vmem [shape: f32[1,32], index: 8, kind: input, shape index: {}]   ;;  %s2015_s9 = inlined_call_operand.vmem [shape: bf16[2,16,32], index: 9, kind: output, shape index: {}]  }
   0x1   :  { %2021 = sst [smem:[#allocation15_spill]] %s2006_s0 }
   0x2   :  { %2022 = sst [smem:[#allocation16_spill]] %s2007_s1 }
   0x3   :  { %2023 = sst [smem:[#allocation17_spill]] %s2008_s2 }
   0x4   :  { %2024 = sst [smem:[#allocation18_spill]] %s2012_s6 }
   0x5   :  { %2025 = sst [smem:[#allocation19_spill]] %s2013_s7 }
   0x6   :  { %2026 = sst [smem:[#allocation20_spill]] %s2014_s8 }
   0x7   :  { %s1748_s30 = smov 0   ;;  %s1750_s10 = smov 0  }
   0x8   :  { %s1752_s11 = smov 0   ;;  %s1754_s12 = smov 0  }
   0x9   :  { %s1756_s13 = smov 0   ;;  %s1758_s14 = smov 0  }
   0xa   :  { %s1760_s15 = smov 0   ;;  %s1762_s16 = smov 0  }
   0xb   :  { %s1764_s17 = smov 0   ;;  %s1766_s18 = smov 0  }
   0xc   :  { %s1768_s19 = smov 0  }
   0xd LB: > { %2027 = sst [smem:[#allocation9_spill]] %s1675_s16  ;;  %s31_s20 = sadd.s32 1, %s1675_s16  ;;  %s1687_s19 = sphi %s1768_s19, %s19_s19   ;;  %s1683_s18 = sphi %s1766_s18, %s2052_s18   ;;  %s1679_s17 = sphi %s1764_s17, %s2045_s17   ;;  %s1675_s16 = sphi %s1762_s16, %s2044_s16   ;;  %s1671_s15 = sphi %s1760_s15, %s2051_s15   ;;  %s1667_s14 = sphi %s1758_s14, %s2043_s14   ;;  %s1663_s13 = sphi %s1756_s13, %s2042_s13   ;;  %s1659_s12 = sphi %s1754_s12, %s2050_s12   ;;  %s1655_s11 = sphi %s1752_s11, %s2049_s11   ;;  %s1651_s10 = sphi %s1750_s10, %s2048_s10   ;;  %s1647_s30 = sphi %s1748_s30, %s2047_s30  }
   0xe   : > { %2028 = sst [smem:[#allocation10_spill]] %s1679_s17  ;;  %s34_s21 = sadd.s32 1, %s1679_s17 }
   0xf   : > { %p32_p0 = scmp.ge.s32.totalorder %s31_s20, 3  ;;  %s38_s22 = sadd.s32 1, %s1683_s18 }
  0x10   : > { %s47_s23 = sadd.s32 1, %s1659_s12  ;;  %p54_p1 = scmp.ne.s32.totalorder %s1659_s12, %s1655_s11 }
  0x11   : > { %s2054_s20 = smov (%p32_p0, %s31_s20), 0  ;;  %s2056_s21 = smov (!%p32_p0, %s34_s21), %s1679_s17 }
  0x12   : > { %2029 = sst [smem:[#allocation11_spill]] %s2054_s20  ;;  %p55_p2 = scmp.eq.s32.totalorder %s1687_s19, 0 }
  0x13   : > { %s70_s24 = sadd.s32 %s1675_s16, %s1679_s17  ;;  %p36_p3 = scmp.ge.s32.totalorder %s2056_s21, 2 }
  0x14   : > { %s1324_s25 = sadd.s32 4294967295, %s70_s24  ;;  %p1817_p4 = por %p55_p2, %p54_p1 }
  0x15   : > { %p72_p5 = scmp.gt.s32.totalorder %s1324_s25, 0  ;;  %s2058_s21 = smov (%p36_p3, %s2056_s21), 0 }
  0x16   : > { %2031 = sst [smem:[#allocation12_spill]] %s2058_s21  ;;  %s2060_s22 = smov (!%p36_p3, %s38_s22), %s1683_s18 }
  0x17   : > { %s43_s27 = ssub.s32 %s1679_s17, %s2058_s21  ;;  %p1325_p6 = scmp.lt.s32.totalorder %s1324_s25, 1 }
  0x18   : > { %p40_p7 = scmp.ge.s32.totalorder %s2060_s22, 2  ;;  %s76_s28 = sadd.s32 %s2058_s21, %s2054_s20 }
  0x19   : > { %s2062_s25 = smov (!%p72_p5, %s1324_s25), 0  ;;  %s1330_s24 = sadd.s32 4294967295, %s76_s28 }
  0x1a   : > { %s2064_s22 = smov (%p40_p7, %s2060_s22), 0  ;;  %s2066_s25 = smov (!%p1325_p6, %s2062_s25), 1 }
  0x1b   : > { %2032 = sst [smem:[#allocation13_spill]] %s2064_s22  ;;  %s42_s29 = ssub.s32 %s1683_s18, %s2064_s22 }
  0x1c   : > { %s44_s16 = sor.u32 %s43_s27, %s42_s29  ;;  %p78_p8 = scmp.gt.s32.totalorder %s1330_s24, 0 }
  0x1d   : > { %p45_p9 = scmp.eq.s32.totalorder %s44_s16, 0  ;;  %p1331_p10 = scmp.lt.s32.totalorder %s1330_s24, 1 }
  0x1e   : > { %s2068_s24 = smov (!%p78_p8, %s1330_s24), 0  ;;  %p94_p11 = scmp.ne.s32.totalorder %s1651_s10, %s1647_s30 }
  0x1f   : > { %s1835_s8 = scalar_select %p45_p9, %s1659_s12, %s47_s23  }
  0x20   : > { %s2070_s24 = smov (!%p1331_p10, %s2068_s24), 1  ;;  %s87_s20 = sadd.s32 1, %s1651_s10 }
  0x21   : > { %2033 = sst [smem:[#allocation14_spill]] %s1835_s8  ;;  %s83_s21 = ssub.s32 %s2066_s25, %s2070_s24 }
  0x22   : > { %s84_s7 = sor.u32 %s83_s21, %s42_s29  ;;  %p1843_p12 = por %p94_p11, %p55_p2 }
  0x23   : > { %p85_p13 = scmp.eq.s32.totalorder %s84_s7, 0  ;;  %p1361_p0 = scmp.ge.s32.totalorder %s1687_s19, 12 }
  0x25   : > { %s1848_s22 = scalar_select %p85_p13, %s1651_s10, %s87_s20  }
  0x26   : > { %352 = sbr.rel (%p1361_p0) target bundleno = 76 (0x4c), region = 32 }
  0x2b   : > { %355 = sbr.rel (!%p1817_p4) target bundleno = 54 (0x36), region = 36  ;;  %s357_s16 = sand.u32 (%p1817_p4), 1, %s1659_s12  }
  0x2c   : > { %s1363_s23 = sshll.u32 (%p1817_p4), %s1683_s18, 2  ;;  %s1362_s21 = sshll.u32 (%p1817_p4), %s357_s16, 3 }
  0x2d   : > { %s361_s27 = sadd.s32 (%p1817_p4), %s1679_s17, %s1363_s23  ;;  %s2035_s0 = sld [smem:[#allocation15_spill]] (%p1817_p4) }
  0x2e   : > { %s1364_s28 = sshll.u32 (%p1817_p4), %s361_s27, 2  ;;  %s359_s20 = scalar_lea.vmem (%p1817_p4), [#allocation6], %s1362_s21 }
  0x33   : > { %s363_s7 = scalar_lea.vmem %s2035_s0, %s1364_s28 }
  0x34   : > { %v380_v0 = vld [vmem:[%s363_s7] sm:$0xf]  ;;  %v382_v1 = vld [vmem:[%s363_s7 + $0x8] sm:$0xf] }
  0x35   : > { %381 = vst [vmem:[%s359_s20] sm:$0xf] %v380_v0  ;;  %383 = vst [vmem:[%s359_s20 + $0x4] sm:$0xf] %v382_v1 }
  0x36 PF: > { %411 = sbr.rel (!%p1843_p12) target bundleno = 65 (0x41), region = 77  ;;  %s413_s26 = sand.u32 (%p1843_p12), 1, %s1651_s10  }
  0x37   : > { %s1372_s16 = sshll.u32 (%p1843_p12), %s1683_s18, 2  ;;  %s1365_s23 = sshll.u32 (%p1843_p12), %s413_s26, 3 }
  0x38   : > { %s423_s27 = sadd.s32 (%p1843_p12), %s2066_s25, %s1372_s16  ;;  %s2036_s1 = sld [smem:[#allocation16_spill]] (%p1843_p12) }
  0x39   : > { %s1373_s17 = sshll.u32 (%p1843_p12), %s423_s27, 2  ;;  %s415_s21 = scalar_lea.vmem (%p1843_p12), [#allocation7], %s1365_s23 }
  0x3e   : > { %s425_s28 = scalar_lea.vmem %s2036_s1, %s1373_s17 }
  0x3f   : > { %v442_v2 = vld [vmem:[%s425_s28] sm:$0xf]  ;;  %v444_v3 = vld [vmem:[%s425_s28 + $0x8] sm:$0xf] }
  0x40   : > { %443 = vst [vmem:[%s415_s21] sm:$0xf] %v442_v2  ;;  %445 = vst [vmem:[%s415_s21 + $0x4] sm:$0xf] %v444_v3 }
  0x41 PF: > { %473 = sbr.rel (!%p1843_p12) target bundleno = 76 (0x4c), region = 118  ;;  %s475_s24 = sand.u32 (%p1843_p12), 1, %s1651_s10  }
  0x42   : > { %s1381_s7 = sshll.u32 (%p1843_p12), %s1683_s18, 2  ;;  %s1374_s20 = sshll.u32 (%p1843_p12), %s475_s24, 3 }
  0x43   : > { %s485_s26 = sadd.s32 (%p1843_p12), %s2066_s25, %s1381_s7  ;;  %s2037_s2 = sld [smem:[#allocation17_spill]] (%p1843_p12) }
  0x44   : > { %s1382_s16 = sshll.u32 (%p1843_p12), %s485_s26, 2  ;;  %s477_s23 = scalar_lea.vmem (%p1843_p12), [#allocation8], %s1374_s20 }
  0x49   : > { %s487_s17 = scalar_lea.vmem %s2037_s2, %s1382_s16 }
  0x4a   : > { %v504_v4 = vld [vmem:[%s487_s17] sm:$0xf]  ;;  %v506_v5 = vld [vmem:[%s487_s17 + $0x8] sm:$0xf] }
  0x4b   : > { %505 = vst [vmem:[%s477_s23] sm:$0xf] %v504_v4  ;;  %507 = vst [vmem:[%s477_s23 + $0x4] sm:$0xf] %v506_v5 }
  0x4c PF: > { %p1383_p1 = scmp.ge.s32.totalorder %s1687_s19, 1  ;;  %p567_p2 = scmp.lt.s32.totalorder %s1687_s19, 13 }
  0x4e   : > { %p568_p3 = pnand %p1383_p1, %p567_p2 }
  0x4f   : > { %s574_s6 = sand.u32 (!%p568_p3), 1, %s1655_s11   ;;  %s581_s25 = sand.u32 (!%p568_p3), 1, %s1647_s30  }
  0x50   : > { %571 = sbr.rel (%p568_p3) target bundleno = 1572 (0x624), region = 167  ;;  %s1879_s29 = sshll.u32 (!%p568_p3), %s574_s6, 3 }
  0x51   : > { %s1881_s28 = sshll.u32 (!%p568_p3), %s581_s25, 3  ;;  %s667_s21 = sadd.s32 (!%p568_p3), %s1663_s13, %s1667_s14 }
  0x52   : > { %s1885_s24 = sadd.s32 (!%p568_p3), 4294967295, %s667_s21  ;;  %p673_p4 = scmp.lt.s32.totalorder (!%p568_p3), %s1671_s15, 1 }
  0x53   : > { %p669_p5 = scmp.gt.s32.totalorder (!%p568_p3), %s1885_s24, 0  ;;  %p1388_p6 = scmp.lt.s32.totalorder (!%p568_p3), %s1885_s24, 1 }
  0x54   : > { %p688_p7 = scmp.lt.s32.totalorder (!%p568_p3), %s1667_s14, 1  ;;  %s583_s2 = scalar_lea.vmem (!%p568_p3), [#allocation7], %s1881_s28 }
  0x55   : > { %s2072_s15 = smov (!%p673_p4, %s1671_s15), 1  ;;  %p1398_p9 = scmp.ne.s32.totalorder %s1663_s13, 0 }
  0x56   : > { %s670_s7 = scalar_select %p669_p5, %s1885_s24, 0 }
  0x57   : > { %s1393_s11 = sshll.u32 %s2072_s15, 1 }
  0x58   : > { %s2074_s7 = smov (!%p1388_p6, %s670_s7), 1 }
  0x59   : > { %s689_s30 = scalar_select %p688_p7, %s1667_s14, 1 }
  0x5a   : > { %p675_p8 = scmp.lt.s32.totalorder %s2074_s7, 1 }
  0x5b   : > { %s691_s20 = sadd.s32 %s1393_s11, %s689_s30  ;;  %s576_s30 = scalar_lea.vmem [#allocation6], %s1879_s29 }
  0x5c   : > { %s676_s26 = scalar_select %p675_p8, %s2074_s7, 1 }
  0x5d   : > { %s1395_s16 = sshll.u32 %s691_s20, 2  ;;  %s590_s20 = scalar_lea.vmem [#allocation8], %s1881_s28 }
  0x5e   : > { %s1898_s27 = sadd.s32 %s1393_s11, %s676_s26  ;;  %s1903_s23 = scalar_lea.vmem %s2010_s4, %s1395_s16 }
  0x5f   : > { %s679_s25 = scalar_lea.vmem %s2009_s3, %s1898_s27  ;;  %s1912_s1 = scalar_lea.vmem %s2015_s9, %s1395_s16 }
  0x60   : > { %706 = sbr.rel (%p1398_p9) target bundleno = 105 (0x69), region = 183 }
  0x65   : > { %vm707_vm0 = vcmask 7168   ;;  %vm712_vm1 = vcmask 130048   ;;  %v1689_v6 = vmov -1e+30   ;;  %v1690_v7 = vmov 0.0  }
  0x66   : > { %708 = vst.msk [vmem:[#allocation3] sm:$0xff] %vm707_vm0, %v1689_v6  ;;  %709 = vst.msk [vmem:[#allocation3 + $0x8] sm:$0xff] %vm707_vm0, %v1689_v6 }
  0x67   : > { %710 = vst.msk [vmem:[#allocation4] sm:$0xff] %vm707_vm0, %v1690_v7  ;;  %711 = vst.msk [vmem:[#allocation4 + $0x8] sm:$0xff] %vm707_vm0, %v1690_v7 }
  0x68   : > { %713 = vst.msk [vmem:[#allocation2] sm:$0xff] %vm712_vm1, %v1690_v7  ;;  %714 = vst.msk [vmem:[#allocation2 + $0x8] sm:$0xff] %vm712_vm1, %v1690_v7 }
  0x69 PF: > { %v717_v8 = vld [vmem:[%s583_s2] sm:$0xf]  ;;  %vm721_vm2 = vcmask 130048   ;;  %v718_v9 = vld [vmem:[%s583_s2 + $0x4] sm:$0xf]  ;;  %v1691_v10 = vmov 0.0   ;;  %v823_v16 = vlaneseq }
  0x6a   : > { %1453 = vmatprep.subr.bf16.mxu0 %v1691_v10  ;;  %1459 = vmatprep.subr.bf16.mxu1 %v1691_v10  ;;  %v726_v11 = vsel %vm721_vm2, %v717_v8, 0  ;;  %v772_v12 = vsel %vm721_vm2, %v718_v9, 0  ;;  %vm1692_vm3 = vmmov 0   ;;  %v715_v13 = vld [vmem:[%s576_s30] sm:$0xf]  ;;  %v1693_v15 = vmov 0  }
  0x6b   : > { %1454 = vmatpush3.bf16.xpose.msra.mxu0 %v726_v11  ;;  %1460 = vmatpush3.bf16.xpose.msra.mxu1 %v772_v12  ;;  %v716_v14 = vld [vmem:[%s576_s30 + $0x4] sm:$0xf]  ;;  %s1407_s0 = sshll.u32 %s1667_s14, 3  ;;  %s1408_s2 = sshll.u32 %s2074_s7, 3  ;;  %v824_v17 = vshrl.u32 %v823_v16, 7  ;;  %v829_v18 = vand.u32 127, %v823_v16 }
  0x6c   : > { %1455 = vmatprep.mubr.msk.bf16.mxu0 %vm1692_vm3, %v1691_v10  ;;  %1461 = vmatprep.mubr.msk.bf16.mxu1 %vm1692_vm3, %v1691_v10  ;;  %v825_v19 = vstv %s1407_s0  ;;  %v830_v20 = vstv %s1408_s2  ;;  %v841_v23 = vld [vmem:[%s679_s25] sm:$0x1]  ;;  %p837_p10 = scmp.ge.s32.totalorder %s1885_s24, 0  ;;  %p838_p11 = scmp.le.s32.totalorder %s1885_s24, 1  ;;  %vm860_vm10 = vcmask 64512   ;;  %vm903_vm11 = vcmask 7168  }
  0x6d   : > { %1465 = vmatprep.subr.bf16.mxu0 %v1691_v10  ;;  %1471 = vmatprep.subr.bf16.mxu1 %v1691_v10  ;;  %v826_v21 = vadd.s32 %v825_v19, %v824_v17  ;;  %v831_v22 = vadd.s32 %v830_v20, %v829_v18  ;;  %vm842_vm4 = vcmp.gt.f32.partialorder %v841_v23, 0.5  ;;  %v846_v26 = vsub.s32 0, %v824_v17  ;;  %v858_v45 = vld [vmem:[#allocation3] sm:$0xff]  ;;  %v859_v48 = vld [vmem:[#allocation3 + $0x8] sm:$0xff]  ;;  %p1413_p13 = scmp.ne.s32.totalorder %s1663_s13, 2 }
  0x6e   : > { %1582 = vset.pattern.permute.xlu1 %v1693_v15  ;;  %1583 = vset.pattern.permute.xlu0 %v1693_v15  ;;  %p839_p12 = pnand %p838_p11, %p837_p10  ;;  %v843_v27 = vsel %vm842_vm4, 1, %v1693_v15  ;;  %v719_v53 = vld [vmem:[%s590_s20] sm:$0xf]  ;;  %vm925_vm12 = vcmask 1043456   ;;  %v720_v54 = vld [vmem:[%s590_s20 + $0x4] sm:$0xf] }
  0x6f   : > { %v832_v24 = vsub.s32 %v826_v21, %v831_v22  ;;  %v847_v29 = vrot.slane %v843_v27, %v846_v26  ;;  %v927_v55 = vsel %vm925_vm12, %v719_v53, 0  ;;  %v973_v56 = vsel %vm925_vm12, %v720_v54, 0  ;;  %v891_v9 = vld [vmem:[#allocation4] sm:$0xff]  ;;  %v892_v12 = vld [vmem:[#allocation4 + $0x8] sm:$0xff]  ;;  %s1697_s26 = smov (!%p1413_p13), 16   ;;  %s2038_s8 = sld [smem:[#allocation18_spill]] (!%p1413_p13) }
  0x70   : > { %s1410_s14 = scalar_select %p839_p12, 0, 1  ;;  %v906_v17 = vld [vmem:[#allocation2] sm:$0xff]  ;;  %v907_v20 = vld [vmem:[#allocation2 + $0x8] sm:$0xff] }
  0x71   : > { %v834_v25 = vsub.s32 0, %v832_v24  ;;  %vm848_vm6 = vcmp.eq.s32.totalorder %v847_v29, 1  ;;  %s2039_s6 = sld [smem:[#allocation19_spill]] (!%p1413_p13) }
  0x72   : > { %1456 = vmatmul.mubr.msk.bf16.vlgmr.msra.gmra.mxu0 %vm721_vm2, %v715_v13  ;;  %1462 = vmatmul.mubr.msk.bf16.vlgmr.msra.gmra.mxu1 %vm721_vm2, %v716_v14  ;;  %v851_v30 = vstv %s1410_s14  ;;  %s2040_s21 = sld [smem:[#allocation20_spill]] (!%p1413_p13) }
  0x73   : > { %1467 = vmatprep.mubr.msk.bf16.mxu0 %vm1692_vm3, %v1691_v10  ;;  %1473 = vmatprep.mubr.msk.bf16.mxu1 %vm1692_vm3, %v1691_v10  ;;  %v1409_v28 = vmin.u32 %v834_v25, %v832_v24  ;;  %vm852_vm8 = vcmp.eq.s32.totalorder %v851_v30, 1 }
  0x74   : > { %1466 = vmatpush3.bf16.msra.mxu0 %v927_v55  ;;  %1472 = vmatpush3.bf16.msra.mxu1 %v973_v56 }
  0x75   : > { %vm836_vm5 = vcmp.le.s32.totalorder %v1409_v28, 2 }
  0x76   : > { %vm849_vm7 = vmand %vm836_vm5, %vm848_vm6 }
  0x77   : > { %vm853_vm9 = vmand %vm849_vm7, %vm852_vm8 }
 0x132   : > { %v762_v31 = vpop.f32.mrf.mxu0  ;;  %v808_v32 = vpop.f32.mrf.mxu1 }
 0x133   : > { %v814_v33 = vmul.f32 0.25, %v762_v31  ;;  %v815_v34 = vmul.f32 0.25, %v808_v32 }
 0x134   : > { %v1457_v35 = vpop.f32.mrf.mxu0  ;;  %v1463_v36 = vpop.f32.mrf.mxu1 }
 0x135   : > { %v856_v37 = vsel %vm853_vm9, %v814_v33, -1e+30  ;;  %v857_v38 = vsel %vm853_vm9, %v815_v34, -1e+30 }
 0x136   : > { %v765_v39 = vpop.f32.mrf.mxu0  ;;  %v811_v40 = vpop.f32.mrf.mxu1  ;;  %v861_v41 = vsel %vm860_vm10, %v856_v37, -inf  ;;  %v864_v44 = vsel %vm860_vm10, %v857_v38, -inf }
 0x137   : > { %862 = vmax.xlane.f32.xlu0 %v861_v41 }
 0x138   : > { %v1458_v42 = vpop.f32.mrf.mxu0  ;;  %v1464_v43 = vpop.f32.mrf.mxu1 }
 0x13b   : > { %865 = vmax.xlane.f32.xlu0 %v864_v44 }
 0x1c0   : > { %v863_v46 = vpop.xlane.xlu0 %862 }
 0x1c1   : > { %v867_v47 = vmax.f32 %v858_v45, %v863_v46 }
 0x1c3   : > { %v869_v49 = vsub.f32 %v858_v45, %v867_v47  ;;  %1019 = vst.msk [vmem:[#allocation3] sm:$0xff] %vm903_vm11, %v867_v47  ;;  %877 = vperm.xlu1 %1582, %v867_v47  }
 0x1c4   : > { %v866_v50 = vpop.xlane.xlu0 %865 }
 0x1c5   : > { %v868_v51 = vmax.f32 %v859_v48, %v866_v50  ;;  %v871_v6 = vmul.f32 1.442695, %v869_v49 }
 0x1c7   : > { %v870_v52 = vsub.f32 %v859_v48, %v868_v51  ;;  %1020 = vst.msk [vmem:[#allocation3 + $0x8] sm:$0xff] %vm903_vm11, %v868_v51  ;;  %882 = vperm.xlu1 %1582, %v868_v51  }
 0x1c9   : > { %v873_v3 = vmul.f32 1.442695, %v870_v52 }
 0x23e   : > { %v878_v57 = vpop.permute.xlu1 %877 }
 0x23f   : > { %v885_v58 = vsub.f32 %v856_v37, %v878_v57 }
 0x241   : > { %v887_v59 = vmul.f32 1.442695, %v885_v58 }
 0x242   : > { %v883_v60 = vpop.permute.xlu1 %882 }
 0x243   : > { %1584 = vpow2.f32 %v887_v59  ;;  %v886_v61 = vsub.f32 %v857_v38, %v883_v60 }
 0x245   : > { %v889_v62 = vmul.f32 1.442695, %v886_v61 }
 0x247   : > { %1586 = vpow2.f32 %v889_v62 }
 0x248   : > { %1588 = vpow2.f32 %v873_v3 }
 0x249   : > { %1590 = vpow2.f32 %v871_v6 }
 0x250   : > { %v1585_v63 = vpop.eup %1584 }
 0x251   : > { %v895_v0 = vsel %vm860_vm10, %v1585_v63, 0.0  ;;  %v920_v1 = vpack.c.bf16 %v1585_v63, %v1585_v63 }
 0x252   : > { %896 = vadd.xlane.f32.xlu0 %v895_v0 }
 0x253   : > { %1468 = vmatmul.mubr.msk.bf16.vlgmr.msra.gmra.mxu0 %vm860_vm10, %v920_v1 }
 0x254   : > { %v1587_v2 = vpop.eup %1586 }
 0x255   : > { %v898_v4 = vsel %vm860_vm10, %v1587_v2, 0.0  ;;  %v921_v5 = vpack.c.bf16 %v1587_v2, %v1587_v2  ;;  %v1589_v7 = vpop.eup %1588 }
 0x256   : > { %899 = vadd.xlane.f32.xlu1 %v898_v4  ;;  %v1591_v8 = vpop.eup %1590  ;;  %v894_v14 = vmul.f32 %v1589_v7, %v892_v12 }
 0x257   : > { %1474 = vmatmul.mubr.msk.bf16.vlgmr.msra.gmra.mxu1 %vm860_vm10, %v921_v5  ;;  %v893_v10 = vmul.f32 %v1591_v8, %v891_v9 }
 0x267   : > { %915 = vperm.xlu1 %1582, %v1589_v7  }
 0x268   : > { %910 = vperm.xlu0 %1583, %v1591_v8  }
 0x2db   : > { %v897_v11 = vpop.xlane.xlu0 %896 }
 0x2dc   : > { %v901_v13 = vadd.f32 %v897_v11, %v893_v10 }
 0x2de   : > { %904 = vst.msk [vmem:[#allocation4] sm:$0xff] %vm903_vm11, %v901_v13 }
 0x2df   : > { %v900_v15 = vpop.xlane.xlu1 %899 }
 0x2e0   : > { %v902_v16 = vadd.f32 %v900_v15, %v894_v14 }
 0x2e2   : > { %905 = vst.msk [vmem:[#allocation4 + $0x8] sm:$0xff] %vm903_vm11, %v902_v16 }
 0x2e3   : > { %v911_v18 = vpop.permute.xlu0 %910  ;;  %v916_v21 = vpop.permute.xlu1 %915 }
 0x2e4   : > { %v918_v19 = vmul.f32 %v911_v18, %v906_v17  ;;  %v919_v25 = vmul.f32 %v916_v21, %v907_v20 }
 0x313   : > { %v963_v22 = vpop.f32.mrf.mxu0 }
 0x314   : > { %v1015_v23 = vadd.f32 %v963_v22, %v918_v19 }
 0x315   : > { %v1469_v24 = vpop.f32.mrf.mxu0 }
 0x316   : > { %1017 = vst.msk [vmem:[#allocation2] sm:$0xff] %vm721_vm2, %v1015_v23 }
 0x317   : > { %v966_v26 = vpop.f32.mrf.mxu0  ;;  %v1009_v27 = vpop.f32.mrf.mxu1 }
 0x318   : > { %v1016_v28 = vadd.f32 %v1009_v27, %v919_v25 }
 0x319   : > { %v1470_v29 = vpop.f32.mrf.mxu0  ;;  %v1475_v30 = vpop.f32.mrf.mxu1  ;;  %1024 = sbr.rel (%p1413_p13) target bundleno = 1572 (0x624), region = 187 }
 0x31a   : > { %1018 = vst.msk [vmem:[#allocation2 + $0x8] sm:$0xff] %vm721_vm2, %v1016_v28 }
 0x31b   : > { %v1012_v31 = vpop.f32.mrf.mxu1 }
 0x31d   : > { %v1476_v32 = vpop.f32.mrf.mxu1 }
 0x31e   : > { %v1026_v33 = vld [vmem:[#allocation4 + $0x8] sm:$0xff]  ;;  %v1025_v34 = vld [vmem:[#allocation4] sm:$0xff]  ;;  %v1694_v35 = vmov 0   ;;  %v1695_v39 = vmov 0.0   ;;  %vm1696_vm13 = vmmov 0   ;;  %vm1048_vm14 = vcmask 261248  }
 0x31f   : > { %1592 = vset.pattern.permute.xlu0 %v1694_v35  ;;  %1595 = vrcp.f32 %v1026_v33  ;;  %v1593_v38 = vld [vmem:[%s2011_s5 + $0x8] sm:$0xff]   ;;  %1477 = vmatprep.subr.bf16.mxu0 %v1695_v39  ;;  %v1594_v40 = vld [vmem:[%s2011_s5] sm:$0xff]   ;;  %vm1075_vm15 = vcmask 261120   ;;  %vm1153_vm0 = vcmask 257024  }
 0x320   : > { %1597 = vrcp.f32 %v1025_v34  ;;  %1481 = vmatprep.mubr.msk.bf16.mxu0 %vm1696_vm13, %v1695_v39  ;;  %1478 = vmatpush3.bf16.msra.mxu0 %v1593_v38  ;;  %v1029_v44 = vld [vmem:[#allocation2] sm:$0xff] }
 0x321   : > { %1479 = vmatprep.subr.bf16.mxu0 %v1695_v39  ;;  %v1030_v41 = vld [vmem:[#allocation2 + $0x8] sm:$0xff]  ;;  %v1119_v50 = vld [vmem:[%s1903_s23] sm:$0xf] }
 0x322   : > { %v1414_v51 = vld [vmem:[%s2038_s8] ss:$0 sm:$0xff]  ;;  %v1120_v52 = vunpack.c.l.bf16 %v1119_v50 }
 0x323   : > { %v1418_v5 = vld [vmem:[%s2039_s6] ss:$0 sm:$0xff] }
 0x324   : > { %1480 = vmatpush3.bf16.msra.mxu0 %v1594_v40  ;;  %v1419_v7 = vld [vmem:[%s2040_s21] ss:$0 sm:$0xff] }
 0x32c   : > { %v1596_v36 = vpop.eup %1595 }
 0x32d   : > { %1038 = vperm.xlu0 %1592, %v1596_v36   ;;  %v1598_v37 = vpop.eup %1597 }
 0x331   : > { %1033 = vperm.xlu0 %1592, %v1598_v37  }
 0x3a8   : > { %v1039_v42 = vpop.permute.xlu0 %1038 }
 0x3a9   : > { %v1042_v43 = vmul.f32 %v1039_v42, %v1030_v41 }
 0x3ab   : > { %1045 = vrot.lane.b32.xlu1 %v1042_v43, %s1697_s26 }
 0x3ac   : > { %v1034_v45 = vpop.permute.xlu0 %1033 }
 0x3ad   : > { %v1041_v46 = vmul.f32 %v1034_v45, %v1029_v44 }
 0x3af   : > { %1043 = vst.msk [vmem:[#allocation5] sm:$0xff] %vm721_vm2, %v1041_v46 }
 0x41d   : > { %v1046_v47 = vpop.permute.xlu1 %1045 }
 0x41e   : > { %1049 = vst.msk [vmem:[#allocation5] sm:$0xff] %vm1048_vm14, %v1046_v47 }
 0x425   : > { %v1050_v48 = vld [vmem:[#allocation5] sm:$0xff] }
 0x426   : > { %v1051_v49 = vpack.c.bf16 %v1050_v48, %v1050_v48 }
 0x428   : > { %1482 = vmatmul.mubr.msk.bf16.vlgmr.msra.gmra.mxu0 %vm1075_vm15, %v1051_v49 }
 0x4e8   : > { %v1113_v53 = vpop.f32.mrf.mxu0 }
 0x4e9   : > { %v1114_v54 = vadd.f32 %v1414_v51, %v1113_v53 }
 0x4ea   : > { %v1483_v55 = vpop.f32.mrf.mxu0 }
 0x4eb   : > { %v1121_v56 = vadd.f32 %v1120_v52, %v1114_v54 }
 0x4ec   : > { %v1116_v57 = vpop.f32.mrf.mxu0 }
 0x4ed   : > { %v1122_v58 = vsel %vm1075_vm15, %v1121_v56, 0.0 }
 0x4ee   : > { %1123 = vadd.xlane.f32.xlu1 %v1122_v58  ;;  %v1484_v59 = vpop.f32.mrf.mxu0 }
 0x577   : > { %v1124_v60 = vpop.xlane.xlu1 %1123 }
 0x578   : > { %v1126_v61 = vmul.f32 0.03125, %v1124_v60 }
 0x57a   : > { %v1127_v62 = vsub.f32 %v1121_v56, %v1126_v61 }
 0x57c   : > { %v1128_v63 = vmul.f32 %v1127_v62, %v1127_v62 }
 0x57e   : > { %v1129_v0 = vsel %vm1075_vm15, %v1128_v63, 0.0 }
 0x57f   : > { %1130 = vadd.xlane.f32.xlu0 %v1129_v0 }
 0x608   : > { %v1131_v1 = vpop.xlane.xlu0 %1130 }
 0x609   : > { %v1132_v2 = vmul.f32 0.03125, %v1131_v1 }
 0x60b   : > { %v1133_v3 = vadd.f32 1e-05, %v1132_v2 }
 0x60d   : > { %1599 = vrsqrt.f32 %v1133_v3 }
 0x61a   : > { %v1600_v4 = vpop.eup %1599 }
 0x61b   : > { %v1135_v6 = vmul.f32 %v1600_v4, %v1127_v62 }
 0x61d   : > { %v1143_v8 = vmul.f32 %v1418_v5, %v1135_v6 }
 0x61f   : > { %v1151_v9 = vadd.f32 %v1419_v7, %v1143_v8 }
 0x621   : > { %v1152_v10 = vpack.c.bf16 %v1151_v9, %v1151_v9 }
 0x623   : > { %1154 = vst.msk [vmem:[%s1912_s1] sm:$0xf] %vm1153_vm0, %v1152_v10 }
 0x624 PF: > { %s19_s19 = sadd.s32 1, %s1687_s19   ;;  %s2041_s20 = sld [smem:[#allocation14_spill]] }
 0x625   : > { %p16_p0 = scmp.ge.s32.totalorder %s19_s19, 14   ;;  %s2042_s13 = sld [smem:[#allocation9_spill]] }
 0x626   : > { %s2043_s14 = sld [smem:[#allocation10_spill]]  ;;  %s2047_s30 = smov %s1651_s10 }
 0x627   : > { %s2044_s16 = sld [smem:[#allocation11_spill]]  ;;  %s2048_s10 = smov %s1848_s22 }
 0x628   : > { %s2045_s17 = sld [smem:[#allocation12_spill]]  ;;  %s2049_s11 = smov %s1659_s12 }
 0x629   : > { %s2046_s0 = sld [smem:[#allocation13_spill]]  ;;  %s2051_s15 = smov %s1683_s18 }
 0x62a   : > { %s2050_s12 = smov %s2041_s20 }
 0x62b   :  { %18 = sbr.rel (!%p16_p0) target bundleno = 13 (0xd), region = 244 }
 0x62f   : > { %s2052_s18 = smov %s2046_s0 }

</bundles_post_ra>
